<compile_context>
chip_gen: v7x
topology: tpu7x:2x2x1
jax: 0.10.0
libtpu: 0.0.40
codegen_flags: <defaults>
</compile_context>

<pallas_src>
import functools
import math

import jax
import jax.numpy as jnp
from jax.experimental import pallas as pl
from jax.experimental.pallas import tpu as pltpu

_LN_EPS = 1e-5
_MASK_NEG = -1e9       # additive value for user-masked (False) entries
_MASK_XMODE = -2e9     # additive value for cross-mode entries of the folded self-attention
_VMEM_LIMIT = 64 * 1024 * 1024


# ----------------------------- in-kernel helpers -----------------------------

def _mm(a, b):
    """(M, K) x (K, N) matmul, f32 accumulation."""
    return jax.lax.dot_general(a, b, (((1,), (0,)), ((), ())),
                               preferred_element_type=jnp.float32)


def _mm_t(a, b):
    """(M, K) x (N, K)^T matmul, f32 accumulation."""
    return jax.lax.dot_general(a, b, (((1,), (1,)), ((), ())),
                               preferred_element_type=jnp.float32)


def _softmax(s):
    s = s - jnp.max(s, axis=-1, keepdims=True)
    p = jnp.exp(s)
    return p * pl.reciprocal(jnp.sum(p, axis=-1, keepdims=True), approx=True)


def _addnorm(x, res, gamma, beta):
    h = x + res
    mu = jnp.mean(h, axis=-1, keepdims=True)
    var = jnp.mean((h - mu) ** 2, axis=-1, keepdims=True)
    return (h - mu) * jax.lax.rsqrt(var + _LN_EPS) * gamma + beta


def _mha(q_p, k_p, v_p, wo_b, num_heads, scale, add_mask):
    """Multi-head attention with per-head accumulated output projection (no concatenate)."""
    d = q_p.shape[-1]
    dh = d // num_heads
    out = jnp.zeros((q_p.shape[0], d), jnp.float32)
    for h in range(num_heads):
        sl = slice(h * dh, (h + 1) * dh)
        s = _mm_t(q_p[:, sl].astype(jnp.bfloat16), k_p[:, sl].astype(jnp.bfloat16)) * scale
        if add_mask is not None:
            s = s + add_mask
        p = _softmax(s)
        ctx = _mm(p.astype(jnp.bfloat16), v_p[:, sl].astype(jnp.bfloat16))       # (R, dh) f32
        out = out + _mm(ctx.astype(jnp.bfloat16), wo_b[sl, :])                   # accumulate
    return out


# ----------------------------- kernel 1: self-attention + AddNorm -----------------------------

def _self_attn_addnorm_kernel(q_ref, mask_ref, *rest, num_heads, scale, has_pad):
    if has_pad:
        pad_ref = rest[0]
        rest = rest[1:]
    wqkv_ref, bqkv_ref, wo_ref, bo_ref, g_ref, b_ref, o_ref = rest

    q = q_ref[0]                                            # (R, D) f32
    d = q.shape[-1]

    # Fused QKV projection over all k_modes rows at once: (R, D) x (D, 3D).
    qkv = _mm(q.astype(jnp.bfloat16), wqkv_ref[...]) + bqkv_ref[...]
    attn = _mha(qkv[:, :d], qkv[:, d:2 * d], qkv[:, 2 * d:], wo_ref[...],
                num_heads, scale, mask_ref[0]) + bo_ref[...]

    # Residual = track_pad_mask-zeroed queries (matches the PyTorch reference), attention
    # itself runs on the unmasked queries.
    res = q * pad_ref[0] if has_pad else q
    o_ref[0] = _addnorm(attn, res, g_ref[...], b_ref[...]).astype(o_ref.dtype)


def self_attn_addnorm(w, queries2d, add_mask, pad_f, num_heads):
    n, r, d = queries2d.shape
    scale = 1.0 / math.sqrt(d // num_heads)
    has_pad = pad_f is not None

    def wspec(shape):
        return pl.BlockSpec(shape, lambda i: (0,) * len(shape))

    in_specs = [pl.BlockSpec((1, r, d), lambda i: (i, 0, 0)),
                pl.BlockSpec((1, r, r), lambda i: (i, 0, 0))]
    operands = [queries2d, add_mask]
    if has_pad:
        in_specs.append(pl.BlockSpec((1, r, 1), lambda i: (i, 0, 0)))
        operands.append(pad_f)
    for nm in ("wqkv", "bqkv", "wo", "bo", "gamma", "beta"):
        in_specs.append(wspec(w[nm].shape))
        operands.append(w[nm])

    kernel = functools.partial(_self_attn_addnorm_kernel, num_heads=num_heads,
                               scale=scale, has_pad=has_pad)
    return pl.pallas_call(
        kernel,
        out_shape=jax.ShapeDtypeStruct((n, r, d), jnp.bfloat16),
        grid=(n,),
        in_specs=in_specs,
        out_specs=pl.BlockSpec((1, r, d), lambda i: (i, 0, 0)),
        compiler_params=pltpu.CompilerParams(
            dimension_semantics=("parallel",),
            vmem_limit_bytes=_VMEM_LIMIT),
    )(*operands)


# ----------------------------- kernel 2: deformable attention -----------------------------

def _deform_kernel(*refs, num_heads, num_points, head_dim, bev_h, bev_w,
                   offset_scale, has_mask):
    if has_mask:
        (q_ref, ref_ref, bev_ref, mask_ref,
         w_oa_ref, b_oa_ref, w_val_ref, b_val_ref, w_out_ref, b_out_ref, o_ref) = refs
    else:
        (q_ref, ref_ref, bev_ref,
         w_oa_ref, b_oa_ref, w_val_ref, b_val_ref, w_out_ref, b_out_ref, o_ref) = refs
        mask_ref = None

    q = q_ref[0]                           # (R, D) f32
    bev = bev_ref[0]                       # (HW, D) bf16
    ref = ref_ref[0]                       # (R, 2) normalized (x, y)
    lq, d = q.shape
    hw = bev.shape[0]
    hp = num_heads * num_points

    # Fused offsets + attention-logits projection: (R, D) x (D, 3*hp).
    proj = _mm(q.astype(jnp.bfloat16), w_oa_ref[...]) + b_oa_ref[...]
    off = proj[:, :2 * hp]                 # all-x then all-y layout
    attn_logits = proj[:, 2 * hp:]

    # Value projection of the BEV features (bev staged as bf16 to halve DMA bytes).
    # TODO(synk): for production BEV grids (e.g. 200x200, D=256) keep bev in pl.ANY (HBM) and
    # DMA/gather only the touched rows, or add an HW grid axis marked 'arbitrary' with a VMEM
    # accumulator -- a resident f32 (HW, D) tile overruns v7x's 64 MiB VMEM and the default
    # scoped limits on v6e/v5e.
    val = _mm(bev, w_val_ref[...]) + b_val_ref[...]                  # (HW, D) f32
    val_b = val.astype(jnp.bfloat16)
    w_out = w_out_ref[...]                                           # (D, D) bf16

    rx = ref[:, 0:1]
    ry = ref[:, 1:2]
    pos = jax.lax.broadcasted_iota(jnp.int32, (lq, hw), 1)           # hoisted out of all loops

    out = jnp.zeros((lq, d), jnp.float32)
    for h in range(num_heads):
        ox = off[:, h * num_points:(h + 1) * num_points]                     # (R, np)
        oy = off[:, hp + h * num_points: hp + (h + 1) * num_points]          # (R, np)
        aw = _softmax(attn_logits[:, h * num_points:(h + 1) * num_points])   # (R, np)

        loc_x = rx + ox * (offset_scale / bev_w)
        loc_y = ry + oy * (offset_scale / bev_h)
        px = loc_x * bev_w - 0.5                                             # align_corners=False
        py = loc_y * bev_h - 0.5
        x0 = jnp.floor(px)
        y0 = jnp.floor(py)
        wx1 = px - x0
        wx0 = 1.0 - wx1
        wy1 = py - y0
        wy0 = 1.0 - wy1
        x0i = x0.astype(jnp.int32)
        y0i = y0.astype(jnp.int32)
        x1i = x0i + 1
        y1i = y0i + 1

        # Fold corner weights, bilinear validity and per-point attention weights into a single
        # (R, HW) weight map -> ONE matmul per head.
        # TODO(synk): replace this dense one-hot build with a row gather of the 4 bilinear
        # corners (jnp.take on the VMEM val tile / DMA gather for HBM-resident bev) for large HW;
        # the one-hot path is kept because it lowers unconditionally at these shapes.
        wmap = jnp.zeros((lq, hw), dtype=jnp.float32)
        for (xi, yi, wgt) in ((x0i, y0i, wx0 * wy0), (x1i, y0i, wx1 * wy0),
                              (x0i, y1i, wx0 * wy1), (x1i, y1i, wx1 * wy1)):
            valid = ((xi >= 0) & (xi < bev_w) & (yi >= 0) & (yi < bev_h)).astype(jnp.float32)
            xcl = jnp.clip(xi, 0, bev_w - 1)
            ycl = jnp.clip(yi, 0, bev_h - 1)
            flat = ycl * bev_w + xcl                                         # (R, np)
            cw = aw * wgt * valid                                            # (R, np)
            for p in range(num_points):
                wmap = wmap + (pos == flat[:, p:p + 1]).astype(jnp.float32) * cw[:, p:p + 1]

        hsl = slice(h * head_dim, (h + 1) * head_dim)
        ctx = _mm(wmap.astype(jnp.bfloat16), val_b[:, hsl])                  # (R, dh) f32
        out = out + _mm(ctx.astype(jnp.bfloat16), w_out[hsl, :])             # accumulate out-proj

    out = out + b_out_ref[...]
    if has_mask:
        # TODO(synk): exact semantics of agent_bev_attn_mask inside DeformableAttention are
        # unspecified; here masked (False) queries produce zero output.
        out = out * mask_ref[0]
    o_ref[0] = out.astype(o_ref.dtype)


def deformable_attention_forward(w, queries2d, ref2d, bev_bf16, mask_f, *,
                                 num_heads, num_points, bev_hw, offset_scale):
    n, r, d = queries2d.shape
    hw = bev_bf16.shape[1]
    h_bev, w_bev = bev_hw
    hp = num_heads * num_points
    has_mask = mask_f is not None

    def wspec(shape):
        return pl.BlockSpec(shape, lambda i: (0,) * len(shape))

    in_specs = [pl.BlockSpec((1, r, d), lambda i: (i, 0, 0)),
                pl.BlockSpec((1, r, 2), lambda i: (i, 0, 0)),
                pl.BlockSpec((1, hw, d), lambda i: (i, 0, 0))]
    operands = [queries2d, ref2d, bev_bf16]
    if has_mask:
        in_specs.append(pl.BlockSpec((1, r, 1), lambda i: (i, 0, 0)))
        operands.append(mask_f)
    for nm in ("w_oa", "b_oa", "w_val", "b_val", "w_out", "b_out"):
        in_specs.append(wspec(w[nm].shape))
        operands.append(w[nm])

    kernel = functools.partial(_deform_kernel, num_heads=num_heads, num_points=num_points,
                               head_dim=d // num_heads, bev_h=h_bev, bev_w=w_bev,
                               offset_scale=offset_scale, has_mask=has_mask)
    return pl.pallas_call(
        kernel,
        out_shape=jax.ShapeDtypeStruct((n, r, d), jnp.bfloat16),
        grid=(n,),
        in_specs=in_specs,
        out_specs=pl.BlockSpec((1, r, d), lambda i: (i, 0, 0)),
        compiler_params=pltpu.CompilerParams(
            dimension_semantics=("parallel",),
            vmem_limit_bytes=_VMEM_LIMIT),
    )(*operands)


# ----------------- kernel 3: dual cross-attention + AddNorm + concat-MLP -----------------

def _cross_mlp_kernel(*refs, num_heads, scale, has_amask, has_mmask):
    idx = 0
    sa_ref = refs[idx]; idx += 1
    trk_ref = refs[idx]; idx += 1
    map_ref = refs[idx]; idx += 1
    goal_ref = refs[idx]; idx += 1
    amask_ref = None
    if has_amask:
        amask_ref = refs[idx]; idx += 1
    mmask_ref = None
    if has_mmask:
        mmask_ref = refs[idx]; idx += 1
    (wq_a, bq_a, wkv_a, bkv_a, wo_a, bo_a, g_a, b_a,
     wq_m, bq_m, wkv_m, bkv_m, wo_m, bo_m, g_m, b_m,
     w1a, w1m, w1g, b1, w2, b2, o_ref) = refs[idx:]

    sa_b = sa_ref[0]                          # (R, D) bf16 (stored bf16 by kernel 1)
    sa_f = sa_b.astype(jnp.float32)           # residual / LayerNorm math in f32
    d = sa_b.shape[-1]

    def cross_branch(kv_ref, wq, bq, wkv, bkv, wo, bo, g, b, mref):
        qp = _mm(sa_b, wq[...]) + bq[...]                                    # (R, D) f32
        kvp = _mm(kv_ref[0].astype(jnp.bfloat16), wkv[...]) + bkv[...]       # (Lk, 2D) f32
        add_mask = mref[0] if mref is not None else None
        attn = _mha(qp, kvp[:, :d], kvp[:, d:], wo[...],
                    num_heads, scale, add_mask) + bo[...]
        return _addnorm(attn, sa_f, g[...], b[...])                          # (R, D) f32

    ag = cross_branch(trk_ref, wq_a, bq_a, wkv_a, bkv_a, wo_a, bo_a, g_a, b_a, amask_ref)
    mp = cross_branch(map_ref, wq_m, bq_m, wkv_m, bkv_m, wo_m, bo_m, g_m, b_m, mmask_ref)

    # concat([ag, mp, goal], -1) @ W1  ==  ag @ W1[:D] + mp @ W1[D:2D] + goal @ W1[2D:]
    h = (_mm(ag.astype(jnp.bfloat16), w1a[...])
         + _mm(mp.astype(jnp.bfloat16), w1m[...])
         + _mm(goal_ref[0], w1g[...]) + b1[...])
    h = jnp.maximum(h, 0.0)
    y = _mm(h.astype(jnp.bfloat16), w2[...]) + b2[...]
    o_ref[0] = y.astype(o_ref.dtype)


def cross_attn_mlp(w, sa, track_kv, map_kv, goal, amask, mmask, num_heads):
    n, r, d = sa.shape
    la = track_kv.shape[1]
    lm = map_kv.shape[1]
    dout = w["w2"].shape[1]
    scale = 1.0 / math.sqrt(d // num_heads)
    has_amask = amask is not None
    has_mmask = mmask is not None

    def wspec(shape):
        return pl.BlockSpec(shape, lambda i: (0,) * len(shape))

    in_specs = [pl.BlockSpec((1, r, d), lambda i: (i, 0, 0)),
                pl.BlockSpec((1, la, d), lambda i: (i, 0, 0)),
                pl.BlockSpec((1, lm, d), lambda i: (i, 0, 0)),
                pl.BlockSpec((1, r, d), lambda i: (i, 0, 0))]
    operands = [sa, track_kv, map_kv, goal]
    if has_amask:
        in_specs.append(pl.BlockSpec((1, r, la), lambda i: (i, 0, 0)))
        operands.append(amask)
    if has_mmask:
        in_specs.append(pl.BlockSpec((1, r, lm), lambda i: (i, 0, 0)))
        operands.append(mmask)
    weight_names = ("wq_a", "bq_a", "wkv_a", "bkv_a", "wo_a", "bo_a", "gamma_a", "beta_a",
                    "wq_m", "bq_m", "wkv_m", "bkv_m", "wo_m", "bo_m", "gamma_m", "beta_m",
                    "w1a", "w1m", "w1g", "b1", "w2", "b2")
    for nm in weight_names:
        in_specs.append(wspec(w[nm].shape))
        operands.append(w[nm])

    kernel = functools.partial(_cross_mlp_kernel, num_heads=num_heads, scale=scale,
                               has_amask=has_amask, has_mmask=has_mmask)
    return pl.pallas_call(
        kernel,
        out_shape=jax.ShapeDtypeStruct((n, r, dout), jnp.float32),
        grid=(n,),
        in_specs=in_specs,
        out_specs=pl.BlockSpec((1, r, dout), lambda i: (i, 0, 0)),
        compiler_params=pltpu.CompilerParams(
            dimension_semantics=("parallel",),
            vmem_limit_bytes=_VMEM_LIMIT),
    )(*operands)


# ----------------------------- parameters -----------------------------

def init_params(key, *, embed_dim, num_heads, num_ref_points, dim_feedforward):
    d = embed_dim
    hp = num_heads * num_ref_points
    keys = iter(jax.random.split(key, 32))

    def dense(shape, scale=0.02):
        return scale * jax.random.normal(next(keys), shape, dtype=jnp.float32)

    def mha_p():
        return dict(wq=dense((d, d)), bq=jnp.zeros((d,), jnp.float32),
                    wk=dense((d, d)), bk=jnp.zeros((d,), jnp.float32),
                    wv=dense((d, d)), bv=jnp.zeros((d,), jnp.float32),
                    wo=dense((d, d)), bo=jnp.zeros((d,), jnp.float32))

    def norm_p():
        return dict(gamma=jnp.ones((d,), jnp.float32), beta=jnp.zeros((d,), jnp.float32))

    return dict(
        self_attn=mha_p(), self_addnorm=norm_p(),
        agent_cross_attn=mha_p(), agent_cross_addnorm=norm_p(),
        map_cross_attn=mha_p(), map_cross_addnorm=norm_p(),
        deform_attn=dict(
            w_off=dense((d, 2 * hp)),
            b_off=0.1 * jax.random.normal(next(keys), (2 * hp,), dtype=jnp.float32),
            w_attn=dense((d, hp)), b_attn=jnp.zeros((hp,), jnp.float32),
            w_val=dense((d, d)), b_val=jnp.zeros((d,), jnp.float32),
            w_out=dense((d, d)), b_out=jnp.zeros((d,), jnp.float32)),
        mlp=dict(w1=dense((3 * d, dim_feedforward)),
                 b1=jnp.zeros((dim_feedforward,), jnp.float32),
                 w2=dense((dim_feedforward, d)),
                 b2=jnp.zeros((d,), jnp.float32)))


def prepare_layer_weights(p):
    """Fuse / reshape / bf16-cast the forward-invariant weights ONCE (outside the forward)."""
    d = p["self_attn"]["wq"].shape[0]

    sa = p["self_attn"]
    self_block = dict(
        wqkv=jnp.concatenate([sa["wq"], sa["wk"], sa["wv"]], axis=1).astype(jnp.bfloat16),
        bqkv=jnp.concatenate([sa["bq"], sa["bk"], sa["bv"]]).reshape(1, 3 * d),
        wo=sa["wo"].astype(jnp.bfloat16),
        bo=sa["bo"].reshape(1, d),
        gamma=p["self_addnorm"]["gamma"].reshape(1, d),
        beta=p["self_addnorm"]["beta"].reshape(1, d))

    def cross_w(ap, np_, sfx):
        return {
            "wq_" + sfx: ap["wq"].astype(jnp.bfloat16),
            "bq_" + sfx: ap["bq"].reshape(1, d),
            "wkv_" + sfx: jnp.concatenate([ap["wk"], ap["wv"]], axis=1).astype(jnp.bfloat16),
            "bkv_" + sfx: jnp.concatenate([ap["bk"], ap["bv"]]).reshape(1, 2 * d),
            "wo_" + sfx: ap["wo"].astype(jnp.bfloat16),
            "bo_" + sfx: ap["bo"].reshape(1, d),
            "gamma_" + sfx: np_["gamma"].reshape(1, d),
            "beta_" + sfx: np_["beta"].reshape(1, d)}

    cross_mlp = {}
    cross_mlp.update(cross_w(p["agent_cross_attn"], p["agent_cross_addnorm"], "a"))
    cross_mlp.update(cross_w(p["map_cross_attn"], p["map_cross_addnorm"], "m"))
    w1 = p["mlp"]["w1"]
    ff = w1.shape[1]
    cross_mlp.update(dict(
        w1a=w1[:d].astype(jnp.bfloat16),          # multiplies agent_ctx
        w1m=w1[d:2 * d].astype(jnp.bfloat16),     # multiplies map_ctx
        w1g=w1[2 * d:].astype(jnp.bfloat16),      # multiplies goal_point
        b1=p["mlp"]["b1"].reshape(1, ff),
        w2=p["mlp"]["w2"].astype(jnp.bfloat16),
        b2=p["mlp"]["b2"].reshape(1, p["mlp"]["w2"].shape[1])))

    dp = p["deform_attn"]
    hp = dp["w_attn"].shape[1]
    deform = dict(
        w_oa=jnp.concatenate([dp["w_off"], dp["w_attn"]], axis=1).astype(jnp.bfloat16),
        b_oa=jnp.concatenate([dp["b_off"], dp["b_attn"]]).reshape(1, 3 * hp),
        w_val=dp["w_val"].astype(jnp.bfloat16),
        b_val=dp["b_val"].reshape(1, d),
        w_out=dp["w_out"].astype(jnp.bfloat16),
        b_out=dp["b_out"].reshape(1, d))

    return dict(self_block=self_block, cross_mlp=cross_mlp, deform=deform)


# ----------------------------- top-level layer -----------------------------

def motionformer_decoder_layer_forward(weights, bev_features, queries, track_queries,
                                       map_queries, ref_points,
                                       track_pad_mask=None, agent_agent_attn_mask=None,
                                       agent_map_attn_mask=None, agent_bev_attn_mask=None,
                                       *, num_heads, num_ref_points, offset_scale=1.0,
                                       bev_feature_hw=(8, 8)):
    n, k, a, d = queries.shape
    r = k * a
    q2 = queries.reshape(n, r, d)

    # Additive masks (small f32 tensors).  The block-diagonal base keeps the k_modes-folded
    # self-attention equivalent to per-mode attention: cross-mode entries use a MORE negative
    # constant so a fully user-masked row still normalizes over its own mode's keys only.
    mode = jnp.arange(r) // a
    base = jnp.where(mode[:, None] == mode[None, :], 0.0, _MASK_XMODE).astype(jnp.float32)
    if agent_agent_attn_mask is not None:
        um = jnp.where(agent_agent_attn_mask[:, 0], 0.0, _MASK_NEG).astype(jnp.float32)  # (N,A,A)
        self_mask = base[None] + jnp.tile(um, (1, k, k))           # (N, R, R)
        agent_cross_mask = jnp.tile(um, (1, k, 1))                 # (N, R, A)
    else:
        self_mask = jnp.broadcast_to(base[None], (n, r, r))
        agent_cross_mask = None
    if agent_map_attn_mask is not None:
        umm = jnp.where(agent_map_attn_mask[:, 0], 0.0, _MASK_NEG).astype(jnp.float32)   # (N,A,M)
        map_cross_mask = jnp.tile(umm, (1, k, 1))                  # (N, R, M)
    else:
        map_cross_mask = None
    pad_f = None
    if track_pad_mask is not None:
        pad_f = jnp.broadcast_to(track_pad_mask.astype(jnp.float32), (n, k, a)).reshape(n, r, 1)

    # Kernel 1: self attention + AddNorm (k_modes folded; fused QKV projection).
    sa = self_attn_addnorm(weights["self_block"], q2, self_mask, pad_f, num_heads)

    # Kernel 2: deformable attention on the ORIGINAL queries (matches the PyTorch reference).
    ref2 = ref_points.reshape(n, r, ref_points.shape[-2], 2)[:, :, 0, :]      # single level
    bev_bf16 = bev_features.astype(jnp.bfloat16)
    bev_mask = None
    if agent_bev_attn_mask is not None:
        bev_mask = agent_bev_attn_mask.astype(jnp.float32).reshape(n, r, 1)
    goal = deformable_attention_forward(weights["deform"], q2, ref2, bev_bf16, bev_mask,
                                        num_heads=num_heads, num_points=num_ref_points,
                                        bev_hw=bev_feature_hw, offset_scale=offset_scale)

    # Kernel 3: agent-cross + map-cross (MHA + AddNorm each) + concat-MLP, fully fused.
    track_kv = track_queries.reshape(n, track_queries.shape[2], d)
    map_kv = map_queries.reshape(n, map_queries.shape[2], d)
    out = cross_attn_mlp(weights["cross_mlp"], sa, track_kv, map_kv, goal,
                         agent_cross_mask, map_cross_mask, num_heads)
    return out.reshape(n, k, a, d)


# ----------------------------- demo -----------------------------

if __name__ == "__main__":
    N, K_MODES, A, M = 2, 2, 4, 6
    D, NUM_HEADS, NUM_REF_POINTS, DIM_FF = 32, 4, 4, 64
    BEV_HW = (8, 8)
    HW = BEV_HW[0] * BEV_HW[1]

    root = jax.random.PRNGKey(0)
    pkey, dkey = jax.random.split(root)
    raw_params = init_params(pkey, embed_dim=D, num_heads=NUM_HEADS,
                             num_ref_points=NUM_REF_POINTS, dim_feedforward=DIM_FF)
    weights = prepare_layer_weights(raw_params)     # fused / bf16 weights built once

    ks = jax.random.split(dkey, 6)
    bev_features = jax.random.normal(ks[0], (N, HW, D), jnp.float32)
    queries = jax.random.normal(ks[1], (N, K_MODES, A, D), jnp.float32)
    track_queries = jax.random.normal(ks[2], (N, 1, A, D), jnp.float32)
    map_queries = jax.random.normal(ks[3], (N, 1, M, D), jnp.float32)
    ref_points = jax.random.uniform(ks[4], (N, K_MODES, A, 1, 2), jnp.float32,
                                    minval=0.1, maxval=0.9)

    track_pad_mask = jnp.ones((N, 1, A), dtype=jnp.bool_).at[1, 0, A - 1].set(False)
    agent_agent_attn_mask = jnp.ones((N, 1, A, A), dtype=jnp.bool_).at[1, 0, :, A - 1].set(False)
    agent_map_attn_mask = jnp.ones((N, 1, A, M), dtype=jnp.bool_).at[0, 0, :, M - 1].set(False)
    agent_bev_attn_mask = jnp.ones((N, K_MODES * A, 1), dtype=jnp.bool_).at[1, -1, 0].set(False)

    out = motionformer_decoder_layer_forward(
        weights, bev_features, queries, track_queries, map_queries, ref_points,
        track_pad_mask=track_pad_mask,
        agent_agent_attn_mask=agent_agent_attn_mask,
        agent_map_attn_mask=agent_map_attn_mask,
        agent_bev_attn_mask=agent_bev_attn_mask,
        num_heads=NUM_HEADS, num_ref_points=NUM_REF_POINTS,
        offset_scale=1.0, bev_feature_hw=BEV_HW)
    out = jax.block_until_ready(out)

    assert out.shape == (N, K_MODES, A, D), out.shape
    assert bool(jnp.all(jnp.isfinite(out)))
    print("KERNEL_OK")
</pallas_src>

<mosaic_0001>
module attributes {stable_mosaic.version = 11 : i64} {
  func.func @_self_attn_addnorm_kernel(%arg0: i32, %arg1: memref<1x8x32xf32, #tpu.memory_space<vmem>>, %arg2: memref<1x8x8xf32, #tpu.memory_space<vmem>>, %arg3: memref<1x8x1xf32, #tpu.memory_space<vmem>>, %arg4: memref<32x96xbf16, #tpu.memory_space<vmem>>, %arg5: memref<1x96xf32, #tpu.memory_space<vmem>>, %arg6: memref<32x32xbf16, #tpu.memory_space<vmem>>, %arg7: memref<1x32xf32, #tpu.memory_space<vmem>>, %arg8: memref<1x32xf32, #tpu.memory_space<vmem>>, %arg9: memref<1x32xf32, #tpu.memory_space<vmem>>, %arg10: memref<1x8x32xbf16, #tpu.memory_space<vmem>>) attributes {dimension_semantics = [#tpu.dimension_semantics<parallel>], iteration_bounds = array<i64: 2>, scalar_prefetch = 0 : i64, scratch_operands = 0 : i64, tpu.core_type = #tpu.core_type<tc>, window_params = [{transform_indices = @transform_0, window_bounds = array<i64: 1, 8, 32>}, {transform_indices = @transform_1, window_bounds = array<i64: 1, 8, 8>}, {transform_indices = @transform_2, window_bounds = array<i64: 1, 8, 1>}, {pipeline_mode = #tpu.pipeline_mode<synchronous>, transform_indices = @transform_3, window_bounds = array<i64: 32, 96>}, {pipeline_mode = #tpu.pipeline_mode<synchronous>, transform_indices = @transform_4, window_bounds = array<i64: 1, 96>}, {pipeline_mode = #tpu.pipeline_mode<synchronous>, transform_indices = @transform_5, window_bounds = array<i64: 32, 32>}, {pipeline_mode = #tpu.pipeline_mode<synchronous>, transform_indices = @transform_6, window_bounds = array<i64: 1, 32>}, {pipeline_mode = #tpu.pipeline_mode<synchronous>, transform_indices = @transform_7, window_bounds = array<i64: 1, 32>}, {pipeline_mode = #tpu.pipeline_mode<synchronous>, transform_indices = @transform_8, window_bounds = array<i64: 1, 32>}, {transform_indices = @transform_9, window_bounds = array<i64: 1, 8, 32>}]} {
    %c0 = arith.constant 0 : index
    %c0_0 = arith.constant 0 : index
    %c0_1 = arith.constant 0 : index
    %0 = vector.load %arg1[%c0, %c0_0, %c0_1] : memref<1x8x32xf32, #tpu.memory_space<vmem>>, vector<1x8x32xf32>
    %1 = vector.shape_cast %0 : vector<1x8x32xf32> to vector<8x32xf32>
    %2 = arith.truncf %1 : vector<8x32xf32> to vector<8x32xbf16>
    %c0_2 = arith.constant 0 : index
    %c0_3 = arith.constant 0 : index
    %3 = vector.load %arg4[%c0_2, %c0_3] : memref<32x96xbf16, #tpu.memory_space<vmem>>, vector<32x96xbf16>
    %cst = arith.constant dense<0.000000e+00> : vector<8x96xf32>
    %4 = tpu.matmul %2, %3, %cst {dimension_numbers = #tpu.dot_dimension_numbers<[1], [0], [0], [1], [0, 0, 1, 1], [], []>} : vector<8x32xbf16>, vector<32x96xbf16>, vector<8x96xf32> -> vector<8x96xf32>
    %c0_4 = arith.constant 0 : index
    %c0_5 = arith.constant 0 : index
    %5 = vector.load %arg5[%c0_4, %c0_5] : memref<1x96xf32, #tpu.memory_space<vmem>>, vector<1x96xf32>
    %6 = vector.broadcast %5 : vector<1x96xf32> to vector<8x96xf32>
    %7 = arith.addf %4, %6 : vector<8x96xf32>
    %8 = vector.extract_strided_slice %7 {offsets = [0, 0], sizes = [8, 32], strides = [1, 1]} : vector<8x96xf32> to vector<8x32xf32>
    %9 = vector.extract_strided_slice %7 {offsets = [0, 32], sizes = [8, 32], strides = [1, 1]} : vector<8x96xf32> to vector<8x32xf32>
    %10 = vector.extract_strided_slice %7 {offsets = [0, 64], sizes = [8, 32], strides = [1, 1]} : vector<8x96xf32> to vector<8x32xf32>
    %c0_6 = arith.constant 0 : index
    %c0_7 = arith.constant 0 : index
    %11 = vector.load %arg6[%c0_6, %c0_7] : memref<32x32xbf16, #tpu.memory_space<vmem>>, vector<32x32xbf16>
    %c0_8 = arith.constant 0 : index
    %c0_9 = arith.constant 0 : index
    %c0_10 = arith.constant 0 : index
    %12 = vector.load %arg2[%c0_8, %c0_9, %c0_10] : memref<1x8x8xf32, #tpu.memory_space<vmem>>, vector<1x8x8xf32>
    %13 = vector.shape_cast %12 : vector<1x8x8xf32> to vector<8x8xf32>
    %cst_11 = arith.constant 0.000000e+00 : f32
    %14 = vector.broadcast %cst_11 : f32 to vector<8x32xf32>
    %15 = vector.extract_strided_slice %8 {offsets = [0, 0], sizes = [8, 8], strides = [1, 1]} : vector<8x32xf32> to vector<8x8xf32>
    %16 = arith.truncf %15 : vector<8x8xf32> to vector<8x8xbf16>
    %17 = vector.extract_strided_slice %9 {offsets = [0, 0], sizes = [8, 8], strides = [1, 1]} : vector<8x32xf32> to vector<8x8xf32>
    %18 = arith.truncf %17 : vector<8x8xf32> to vector<8x8xbf16>
    %cst_12 = arith.constant dense<0.000000e+00> : vector<8x8xf32>
    %19 = tpu.matmul %16, %18, %cst_12 {dimension_numbers = #tpu.dot_dimension_numbers<[1], [1], [0], [0], [0, 0, 1, 0], [], []>} : vector<8x8xbf16>, vector<8x8xbf16>, vector<8x8xf32> -> vector<8x8xf32>
    %cst_13 = arith.constant 0.353553385 : f32
    %20 = vector.broadcast %cst_13 : f32 to vector<8x8xf32>
    %21 = arith.mulf %19, %20 : vector<8x8xf32>
    %22 = arith.addf %21, %13 : vector<8x8xf32>
    %cst_14 = arith.constant dense<0xFF800000> : vector<8xf32>
    %23 = vector.multi_reduction <maximumf>, %22, %cst_14 [1] : vector<8x8xf32> to vector<8xf32>
    %24 = vector.shape_cast %23 : vector<8xf32> to vector<8x1xf32>
    %25 = vector.broadcast %24 : vector<8x1xf32> to vector<8x8xf32>
    %26 = arith.subf %22, %25 : vector<8x8xf32>
    %27 = math.exp %26 : vector<8x8xf32>
    %cst_15 = arith.constant dense<0.000000e+00> : vector<8xf32>
    %28 = vector.multi_reduction <add>, %27, %cst_15 [1] : vector<8x8xf32> to vector<8xf32>
    %29 = vector.shape_cast %28 : vector<8xf32> to vector<8x1xf32>
    %30 = tpu.reciprocal %29 {approx = true} : vector<8x1xf32> -> vector<8x1xf32>
    %31 = vector.broadcast %30 : vector<8x1xf32> to vector<8x8xf32>
    %32 = arith.mulf %27, %31 : vector<8x8xf32>
    %33 = arith.truncf %32 : vector<8x8xf32> to vector<8x8xbf16>
    %34 = vector.extract_strided_slice %10 {offsets = [0, 0], sizes = [8, 8], strides = [1, 1]} : vector<8x32xf32> to vector<8x8xf32>
    %35 = arith.truncf %34 : vector<8x8xf32> to vector<8x8xbf16>
    %cst_16 = arith.constant dense<0.000000e+00> : vector<8x8xf32>
    %36 = tpu.matmul %33, %35, %cst_16 {dimension_numbers = #tpu.dot_dimension_numbers<[1], [0], [0], [1], [0, 0, 1, 1], [], []>} : vector<8x8xbf16>, vector<8x8xbf16>, vector<8x8xf32> -> vector<8x8xf32>
    %37 = arith.truncf %36 : vector<8x8xf32> to vector<8x8xbf16>
    %38 = vector.extract_strided_slice %11 {offsets = [0, 0], sizes = [8, 32], strides = [1, 1]} : vector<32x32xbf16> to vector<8x32xbf16>
    %cst_17 = arith.constant dense<0.000000e+00> : vector<8x32xf32>
    %39 = tpu.matmul %37, %38, %cst_17 {dimension_numbers = #tpu.dot_dimension_numbers<[1], [0], [0], [1], [0, 0, 1, 1], [], []>} : vector<8x8xbf16>, vector<8x32xbf16>, vector<8x32xf32> -> vector<8x32xf32>
    %40 = arith.addf %14, %39 : vector<8x32xf32>
    %41 = vector.extract_strided_slice %8 {offsets = [0, 8], sizes = [8, 8], strides = [1, 1]} : vector<8x32xf32> to vector<8x8xf32>
    %42 = arith.truncf %41 : vector<8x8xf32> to vector<8x8xbf16>
    %43 = vector.extract_strided_slice %9 {offsets = [0, 8], sizes = [8, 8], strides = [1, 1]} : vector<8x32xf32> to vector<8x8xf32>
    %44 = arith.truncf %43 : vector<8x8xf32> to vector<8x8xbf16>
    %cst_18 = arith.constant dense<0.000000e+00> : vector<8x8xf32>
    %45 = tpu.matmul %42, %44, %cst_18 {dimension_numbers = #tpu.dot_dimension_numbers<[1], [1], [0], [0], [0, 0, 1, 0], [], []>} : vector<8x8xbf16>, vector<8x8xbf16>, vector<8x8xf32> -> vector<8x8xf32>
    %cst_19 = arith.constant 0.353553385 : f32
    %46 = vector.broadcast %cst_19 : f32 to vector<8x8xf32>
    %47 = arith.mulf %45, %46 : vector<8x8xf32>
    %48 = arith.addf %47, %13 : vector<8x8xf32>
    %cst_20 = arith.constant dense<0xFF800000> : vector<8xf32>
    %49 = vector.multi_reduction <maximumf>, %48, %cst_20 [1] : vector<8x8xf32> to vector<8xf32>
    %50 = vector.shape_cast %49 : vector<8xf32> to vector<8x1xf32>
    %51 = vector.broadcast %50 : vector<8x1xf32> to vector<8x8xf32>
    %52 = arith.subf %48, %51 : vector<8x8xf32>
    %53 = math.exp %52 : vector<8x8xf32>
    %cst_21 = arith.constant dense<0.000000e+00> : vector<8xf32>
    %54 = vector.multi_reduction <add>, %53, %cst_21 [1] : vector<8x8xf32> to vector<8xf32>
    %55 = vector.shape_cast %54 : vector<8xf32> to vector<8x1xf32>
    %56 = tpu.reciprocal %55 {approx = true} : vector<8x1xf32> -> vector<8x1xf32>
    %57 = vector.broadcast %56 : vector<8x1xf32> to vector<8x8xf32>
    %58 = arith.mulf %53, %57 : vector<8x8xf32>
    %59 = arith.truncf %58 : vector<8x8xf32> to vector<8x8xbf16>
    %60 = vector.extract_strided_slice %10 {offsets = [0, 8], sizes = [8, 8], strides = [1, 1]} : vector<8x32xf32> to vector<8x8xf32>
    %61 = arith.truncf %60 : vector<8x8xf32> to vector<8x8xbf16>
    %cst_22 = arith.constant dense<0.000000e+00> : vector<8x8xf32>
    %62 = tpu.matmul %59, %61, %cst_22 {dimension_numbers = #tpu.dot_dimension_numbers<[1], [0], [0], [1], [0, 0, 1, 1], [], []>} : vector<8x8xbf16>, vector<8x8xbf16>, vector<8x8xf32> -> vector<8x8xf32>
    %63 = arith.truncf %62 : vector<8x8xf32> to vector<8x8xbf16>
    %64 = vector.extract_strided_slice %11 {offsets = [8, 0], sizes = [8, 32], strides = [1, 1]} : vector<32x32xbf16> to vector<8x32xbf16>
    %cst_23 = arith.constant dense<0.000000e+00> : vector<8x32xf32>
    %65 = tpu.matmul %63, %64, %cst_23 {dimension_numbers = #tpu.dot_dimension_numbers<[1], [0], [0], [1], [0, 0, 1, 1], [], []>} : vector<8x8xbf16>, vector<8x32xbf16>, vector<8x32xf32> -> vector<8x32xf32>
    %66 = arith.addf %40, %65 : vector<8x32xf32>
    %67 = vector.extract_strided_slice %8 {offsets = [0, 16], sizes = [8, 8], strides = [1, 1]} : vector<8x32xf32> to vector<8x8xf32>
    %68 = arith.truncf %67 : vector<8x8xf32> to vector<8x8xbf16>
    %69 = vector.extract_strided_slice %9 {offsets = [0, 16], sizes = [8, 8], strides = [1, 1]} : vector<8x32xf32> to vector<8x8xf32>
    %70 = arith.truncf %69 : vector<8x8xf32> to vector<8x8xbf16>
    %cst_24 = arith.constant dense<0.000000e+00> : vector<8x8xf32>
    %71 = tpu.matmul %68, %70, %cst_24 {dimension_numbers = #tpu.dot_dimension_numbers<[1], [1], [0], [0], [0, 0, 1, 0], [], []>} : vector<8x8xbf16>, vector<8x8xbf16>, vector<8x8xf32> -> vector<8x8xf32>
    %cst_25 = arith.constant 0.353553385 : f32
    %72 = vector.broadcast %cst_25 : f32 to vector<8x8xf32>
    %73 = arith.mulf %71, %72 : vector<8x8xf32>
    %74 = arith.addf %73, %13 : vector<8x8xf32>
    %cst_26 = arith.constant dense<0xFF800000> : vector<8xf32>
    %75 = vector.multi_reduction <maximumf>, %74, %cst_26 [1] : vector<8x8xf32> to vector<8xf32>
    %76 = vector.shape_cast %75 : vector<8xf32> to vector<8x1xf32>
    %77 = vector.broadcast %76 : vector<8x1xf32> to vector<8x8xf32>
    %78 = arith.subf %74, %77 : vector<8x8xf32>
    %79 = math.exp %78 : vector<8x8xf32>
    %cst_27 = arith.constant dense<0.000000e+00> : vector<8xf32>
    %80 = vector.multi_reduction <add>, %79, %cst_27 [1] : vector<8x8xf32> to vector<8xf32>
    %81 = vector.shape_cast %80 : vector<8xf32> to vector<8x1xf32>
    %82 = tpu.reciprocal %81 {approx = true} : vector<8x1xf32> -> vector<8x1xf32>
    %83 = vector.broadcast %82 : vector<8x1xf32> to vector<8x8xf32>
    %84 = arith.mulf %79, %83 : vector<8x8xf32>
    %85 = arith.truncf %84 : vector<8x8xf32> to vector<8x8xbf16>
    %86 = vector.extract_strided_slice %10 {offsets = [0, 16], sizes = [8, 8], strides = [1, 1]} : vector<8x32xf32> to vector<8x8xf32>
    %87 = arith.truncf %86 : vector<8x8xf32> to vector<8x8xbf16>
    %cst_28 = arith.constant dense<0.000000e+00> : vector<8x8xf32>
    %88 = tpu.matmul %85, %87, %cst_28 {dimension_numbers = #tpu.dot_dimension_numbers<[1], [0], [0], [1], [0, 0, 1, 1], [], []>} : vector<8x8xbf16>, vector<8x8xbf16>, vector<8x8xf32> -> vector<8x8xf32>
    %89 = arith.truncf %88 : vector<8x8xf32> to vector<8x8xbf16>
    %90 = vector.extract_strided_slice %11 {offsets = [16, 0], sizes = [8, 32], strides = [1, 1]} : vector<32x32xbf16> to vector<8x32xbf16>
    %cst_29 = arith.constant dense<0.000000e+00> : vector<8x32xf32>
    %91 = tpu.matmul %89, %90, %cst_29 {dimension_numbers = #tpu.dot_dimension_numbers<[1], [0], [0], [1], [0, 0, 1, 1], [], []>} : vector<8x8xbf16>, vector<8x32xbf16>, vector<8x32xf32> -> vector<8x32xf32>
    %92 = arith.addf %66, %91 : vector<8x32xf32>
    %93 = vector.extract_strided_slice %8 {offsets = [0, 24], sizes = [8, 8], strides = [1, 1]} : vector<8x32xf32> to vector<8x8xf32>
    %94 = arith.truncf %93 : vector<8x8xf32> to vector<8x8xbf16>
    %95 = vector.extract_strided_slice %9 {offsets = [0, 24], sizes = [8, 8], strides = [1, 1]} : vector<8x32xf32> to vector<8x8xf32>
    %96 = arith.truncf %95 : vector<8x8xf32> to vector<8x8xbf16>
    %cst_30 = arith.constant dense<0.000000e+00> : vector<8x8xf32>
    %97 = tpu.matmul %94, %96, %cst_30 {dimension_numbers = #tpu.dot_dimension_numbers<[1], [1], [0], [0], [0, 0, 1, 0], [], []>} : vector<8x8xbf16>, vector<8x8xbf16>, vector<8x8xf32> -> vector<8x8xf32>
    %cst_31 = arith.constant 0.353553385 : f32
    %98 = vector.broadcast %cst_31 : f32 to vector<8x8xf32>
    %99 = arith.mulf %97, %98 : vector<8x8xf32>
    %100 = arith.addf %99, %13 : vector<8x8xf32>
    %cst_32 = arith.constant dense<0xFF800000> : vector<8xf32>
    %101 = vector.multi_reduction <maximumf>, %100, %cst_32 [1] : vector<8x8xf32> to vector<8xf32>
    %102 = vector.shape_cast %101 : vector<8xf32> to vector<8x1xf32>
    %103 = vector.broadcast %102 : vector<8x1xf32> to vector<8x8xf32>
    %104 = arith.subf %100, %103 : vector<8x8xf32>
    %105 = math.exp %104 : vector<8x8xf32>
    %cst_33 = arith.constant dense<0.000000e+00> : vector<8xf32>
    %106 = vector.multi_reduction <add>, %105, %cst_33 [1] : vector<8x8xf32> to vector<8xf32>
    %107 = vector.shape_cast %106 : vector<8xf32> to vector<8x1xf32>
    %108 = tpu.reciprocal %107 {approx = true} : vector<8x1xf32> -> vector<8x1xf32>
    %109 = vector.broadcast %108 : vector<8x1xf32> to vector<8x8xf32>
    %110 = arith.mulf %105, %109 : vector<8x8xf32>
    %111 = arith.truncf %110 : vector<8x8xf32> to vector<8x8xbf16>
    %112 = vector.extract_strided_slice %10 {offsets = [0, 24], sizes = [8, 8], strides = [1, 1]} : vector<8x32xf32> to vector<8x8xf32>
    %113 = arith.truncf %112 : vector<8x8xf32> to vector<8x8xbf16>
    %cst_34 = arith.constant dense<0.000000e+00> : vector<8x8xf32>
    %114 = tpu.matmul %111, %113, %cst_34 {dimension_numbers = #tpu.dot_dimension_numbers<[1], [0], [0], [1], [0, 0, 1, 1], [], []>} : vector<8x8xbf16>, vector<8x8xbf16>, vector<8x8xf32> -> vector<8x8xf32>
    %115 = arith.truncf %114 : vector<8x8xf32> to vector<8x8xbf16>
    %116 = vector.extract_strided_slice %11 {offsets = [24, 0], sizes = [8, 32], strides = [1, 1]} : vector<32x32xbf16> to vector<8x32xbf16>
    %cst_35 = arith.constant dense<0.000000e+00> : vector<8x32xf32>
    %117 = tpu.matmul %115, %116, %cst_35 {dimension_numbers = #tpu.dot_dimension_numbers<[1], [0], [0], [1], [0, 0, 1, 1], [], []>} : vector<8x8xbf16>, vector<8x32xbf16>, vector<8x32xf32> -> vector<8x32xf32>
    %118 = arith.addf %92, %117 : vector<8x32xf32>
    %c0_36 = arith.constant 0 : index
    %c0_37 = arith.constant 0 : index
    %119 = vector.load %arg7[%c0_36, %c0_37] : memref<1x32xf32, #tpu.memory_space<vmem>>, vector<1x32xf32>
    %120 = vector.broadcast %119 : vector<1x32xf32> to vector<8x32xf32>
    %121 = arith.addf %118, %120 : vector<8x32xf32>
    %c0_38 = arith.constant 0 : index
    %c0_39 = arith.constant 0 : index
    %c0_40 = arith.constant 0 : index
    %122 = vector.load %arg3[%c0_38, %c0_39, %c0_40] : memref<1x8x1xf32, #tpu.memory_space<vmem>>, vector<1x8x1xf32>
    %123 = vector.shape_cast %122 : vector<1x8x1xf32> to vector<8x1xf32>
    %124 = vector.broadcast %123 : vector<8x1xf32> to vector<8x32xf32>
    %125 = arith.mulf %1, %124 : vector<8x32xf32>
    %c0_41 = arith.constant 0 : index
    %c0_42 = arith.constant 0 : index
    %126 = vector.load %arg8[%c0_41, %c0_42] : memref<1x32xf32, #tpu.memory_space<vmem>>, vector<1x32xf32>
    %c0_43 = arith.constant 0 : index
    %c0_44 = arith.constant 0 : index
    %127 = vector.load %arg9[%c0_43, %c0_44] : memref<1x32xf32, #tpu.memory_space<vmem>>, vector<1x32xf32>
    %128 = arith.addf %121, %125 : vector<8x32xf32>
    %cst_45 = arith.constant dense<0.000000e+00> : vector<8xf32>
    %129 = vector.multi_reduction <add>, %128, %cst_45 [1] : vector<8x32xf32> to vector<8xf32>
    %130 = vector.shape_cast %129 : vector<8xf32> to vector<8x1xf32>
    %cst_46 = arith.constant 3.200000e+01 : f32
    %131 = vector.broadcast %cst_46 : f32 to vector<8x1xf32>
    %132 = arith.divf %130, %131 : vector<8x1xf32>
    %133 = vector.broadcast %132 : vector<8x1xf32> to vector<8x32xf32>
    %134 = arith.subf %128, %133 : vector<8x32xf32>
    %135 = arith.mulf %134, %134 : vector<8x32xf32>
    %cst_47 = arith.constant dense<0.000000e+00> : vector<8xf32>
    %136 = vector.multi_reduction <add>, %135, %cst_47 [1] : vector<8x32xf32> to vector<8xf32>
    %137 = vector.shape_cast %136 : vector<8xf32> to vector<8x1xf32>
    %cst_48 = arith.constant 3.200000e+01 : f32
    %138 = vector.broadcast %cst_48 : f32 to vector<8x1xf32>
    %139 = arith.divf %137, %138 : vector<8x1xf32>
    %140 = vector.broadcast %132 : vector<8x1xf32> to vector<8x32xf32>
    %141 = arith.subf %128, %140 : vector<8x32xf32>
    %cst_49 = arith.constant 9.99999974E-6 : f32
    %142 = vector.broadcast %cst_49 : f32 to vector<8x1xf32>
    %143 = arith.addf %139, %142 : vector<8x1xf32>
    %144 = math.rsqrt %143 : vector<8x1xf32>
    %145 = vector.broadcast %144 : vector<8x1xf32> to vector<8x32xf32>
    %146 = arith.mulf %141, %145 : vector<8x32xf32>
    %147 = vector.broadcast %126 : vector<1x32xf32> to vector<8x32xf32>
    %148 = arith.mulf %146, %147 : vector<8x32xf32>
    %149 = vector.broadcast %127 : vector<1x32xf32> to vector<8x32xf32>
    %150 = arith.addf %148, %149 : vector<8x32xf32>
    %151 = arith.truncf %150 : vector<8x32xf32> to vector<8x32xbf16>
    %c0_50 = arith.constant 0 : index
    %c0_51 = arith.constant 0 : index
    %c0_52 = arith.constant 0 : index
    %152 = vector.load %arg10[%c0_50, %c0_51, %c0_52] : memref<1x8x32xbf16, #tpu.memory_space<vmem>>, vector<1x8x32xbf16>
    %153 = vector.shape_cast %152 : vector<1x8x32xbf16> to vector<8x32xbf16>
    %154 = vector.shape_cast %151 : vector<8x32xbf16> to vector<1x8x32xbf16>
    tpu.vector_store %arg10[%c0_50, %c0_51, %c0_52], %154 {strides = array<i32>} : memref<1x8x32xbf16, #tpu.memory_space<vmem>>, vector<1x8x32xbf16>,
    return
  }
  func.func @transform_0(%arg0: i32) -> (i32, i32, i32) {
    %c0_i32 = arith.constant 0 : i32
    %c0_i32_0 = arith.constant 0 : i32
    %c0_i32_1 = arith.constant 0 : i32
    return %arg0, %c0_i32, %c0_i32_0 : i32, i32, i32
  }
  func.func @transform_1(%arg0: i32) -> (i32, i32, i32) {
    %c0_i32 = arith.constant 0 : i32
    %c0_i32_0 = arith.constant 0 : i32
    %c0_i32_1 = arith.constant 0 : i32
    return %arg0, %c0_i32, %c0_i32_0 : i32, i32, i32
  }
  func.func @transform_2(%arg0: i32) -> (i32, i32, i32) {
    %c0_i32 = arith.constant 0 : i32
    %c0_i32_0 = arith.constant 0 : i32
    %c0_i32_1 = arith.constant 0 : i32
    return %arg0, %c0_i32, %c0_i32_0 : i32, i32, i32
  }
  func.func @transform_3(%arg0: i32) -> (i32, i32) {
    %c0_i32 = arith.constant 0 : i32
    %c0_i32_0 = arith.constant 0 : i32
    %c0_i32_1 = arith.constant 0 : i32
    return %c0_i32, %c0_i32_0 : i32, i32
  }
  func.func @transform_4(%arg0: i32) -> (i32, i32) {
    %c0_i32 = arith.constant 0 : i32
    %c0_i32_0 = arith.constant 0 : i32
    %c0_i32_1 = arith.constant 0 : i32
    return %c0_i32, %c0_i32_0 : i32, i32
  }
  func.func @transform_5(%arg0: i32) -> (i32, i32) {
    %c0_i32 = arith.constant 0 : i32
    %c0_i32_0 = arith.constant 0 : i32
    %c0_i32_1 = arith.constant 0 : i32
    return %c0_i32, %c0_i32_0 : i32, i32
  }
  func.func @transform_6(%arg0: i32) -> (i32, i32) {
    %c0_i32 = arith.constant 0 : i32
    %c0_i32_0 = arith.constant 0 : i32
    %c0_i32_1 = arith.constant 0 : i32
    return %c0_i32, %c0_i32_0 : i32, i32
  }
  func.func @transform_7(%arg0: i32) -> (i32, i32) {
    %c0_i32 = arith.constant 0 : i32
    %c0_i32_0 = arith.constant 0 : i32
    %c0_i32_1 = arith.constant 0 : i32
    return %c0_i32, %c0_i32_0 : i32, i32
  }
  func.func @transform_8(%arg0: i32) -> (i32, i32) {
    %c0_i32 = arith.constant 0 : i32
    %c0_i32_0 = arith.constant 0 : i32
    %c0_i32_1 = arith.constant 0 : i32
    return %c0_i32, %c0_i32_0 : i32, i32
  }
  func.func @transform_9(%arg0: i32) -> (i32, i32, i32) {
    %c0_i32 = arith.constant 0 : i32
    %c0_i32_0 = arith.constant 0 : i32
    %c0_i32_1 = arith.constant 0 : i32
    return %arg0, %c0_i32, %c0_i32_0 : i32, i32, i32
  }
}

</mosaic_0001>

<bundles_post_ra>
// kernel: tpu_custom_call.1
= control target key start
LH: loop header
LB: loop body
LE: loop exit
PB: predicated region body
PF: predicated region fallthrough
CT: control target
= control target key end

     0   :  { %s2673_s0 = inlined_call_operand.hbm [shape: f32[2,8,32], index: 0, kind: input, shape index: {}]   ;;  %s2674_s1 = inlined_call_operand.hbm [shape: f32[2,8,8], index: 1, kind: input, shape index: {}]   ;;  %s2675_s2 = inlined_call_operand.hbm [shape: f32[2,8,1], index: 2, kind: input, shape index: {}]   ;;  %s2676_s3 = inlined_call_operand.hbm [shape: bf16[32,96], index: 3, kind: input, shape index: {}]   ;;  %s2677_s4 = inlined_call_operand.hbm [shape: f32[1,96], index: 4, kind: input, shape index: {}]   ;;  %s2678_s5 = inlined_call_operand.hbm [shape: bf16[32,32], index: 5, kind: input, shape index: {}]   ;;  %s2679_s6 = inlined_call_operand.hbm [shape: f32[1,32], index: 6, kind: input, shape index: {}]   ;;  %s2680_s7 = inlined_call_operand.hbm [shape: f32[1,32], index: 7, kind: input, shape index: {}]   ;;  %s2681_s8 = inlined_call_operand.hbm [shape: f32[1,32], index: 8, kind: input, shape index: {}]   ;;  %s2682_s9 = inlined_call_operand.hbm [shape: bf16[2,8,32], index: 9, kind: output, shape index: {}]  }
   0x1   :  { %2702 = sst [smem:[#allocation29_spill]] %s2674_s1 }
   0x2   :  { %2703 = sst [smem:[#allocation30_spill]] %s2676_s3 }
   0x3   :  { %2704 = sst [smem:[#allocation31_spill]] %s2678_s5 }
   0x4   :  { %2705 = sst [smem:[#allocation32_spill]] %s2680_s7 }
   0x5   :  { %2706 = sst [smem:[#allocation33_spill]] %s2682_s9 }
   0x6   :  { %14 = vsyncpa [#allocation3], 0 }
   0x7   :  { %16 = vsyncpa [#allocation3 + $0x1], 0 }
   0x8   :  { %17 = vsyncpa [#allocation6], 0 }
   0x9   :  { %19 = vsyncpa [#allocation6 + $0x1], 0 }
   0xa   :  { %20 = vsyncpa [#allocation9], 0 }
   0xb   :  { %21 = vsyncpa [#allocation12], 0 }
   0xc   :  { %22 = vsyncpa [#allocation15], 0 }
   0xd   :  { %23 = vsyncpa [#allocation4], 0 }
   0xe   :  { %25 = vsyncpa [#allocation4 + $0x1], 0  ;;  %s2175_s30 = smov 0   ;;  %s2177_s10 = smov 0  }
   0xf   :  { %s2179_s11 = smov 0   ;;  %s2181_s12 = smov 0  }
  0x10 LB: > { %2707 = sst [smem:[#allocation24_spill]] %s2085_s30  ;;  %s2099_s13 = smov [#allocation8]   ;;  %s2097_s12 = sphi %s2181_s12, %s2745_s12   ;;  %s2093_s11 = sphi %s2179_s11, %s2749_s11   ;;  %s2089_s10 = sphi %s2177_s10, %s2748_s10   ;;  %s2085_s30 = sphi %s2175_s30, %s2747_s30  }
  0x11   : > { %2708 = sst [smem:[#allocation25_spill]] %s2097_s12  ;;  %s278_s14 = sshll.u32 %s2099_s13, 4  ;;  %s2201_s14 = int_to_ptr.vmem [resolvable:$true] %s278_s14 }
  0x12   : > { %s2196_s15 = sadd.s32 4294967295, %s2097_s12   ;;  %p1447_p0 = scmp.ge.s32.totalorder %s2097_s12, 1 }
  0x13   : > { %p2688_p1 = scmp.eq.s32.totalorder %s2196_s15, 0  ;;  %p266_p2 = scmp.lt.s32.totalorder %s2097_s12, 3 }
  0x14   : > { %s2100_s17 = smov [#allocation11]   ;;  %s2101_s20 = smov [#allocation14]  }
  0x15   : > { %p2203_p3 = pnand %p1447_p0, %p266_p2  ;;  %s302_s18 = sshll.u32 %s2100_s17, 4  ;;  %s2216_s18 = int_to_ptr.vmem [resolvable:$true] %s302_s18 }
  0x16   : > { %s327_s21 = sshll.u32 %s2101_s20, 4  ;;  %s2711_s3 = sld [smem:[#allocation30_spill]]  ;;  %s2218_s21 = int_to_ptr.vmem [resolvable:$true] %s327_s21 }
  0x17   : > { %s2709_s16 = scalar_select %p2203_p3, 1, 0 }
  0x18   : > { %p1634_p5 = pneg %p2203_p3 }
  0x1a   : > { %p2212_p6 = pnand %p1634_p5, %p2688_p1 }
  0x1c   : > { %s2710_s19 = scalar_select %p2212_p6, 1, 0 }
  0x1d   : > { %s1757_s24 = scalar_lea.hbm %s2711_s3, 256  ;;  %p2228_p8 = pneg %p2212_p6 }
  0x1e   : > { %p1758_p7 = scmp.ne.s32.totalorder %s2711_s3, %s1757_s24  ;;  %p1764_p11 = scmp.lt.u32.totalorder %s1757_s24, %s2711_s3 }
  0x1f   : > { %s2712_s27 = scalar_select %p2228_p8, 1, 0 }
  0x20   : > { %p1760_p9 = pnand %p2228_p8, %p1758_p7 }
  0x22   : > { %p1761_p10 = pneg %p1760_p9 }
  0x24   : > { %p1766_p12 = pnand %p1764_p11, %p1761_p10 }
  0x26   : > { %1769 = shalt.err (!%p1766_p12)
}
  0x27   : > { %s1770_s13 = scalar_lea.vmem %s2201_s14, 256  ;;  %p1778_p5 = scmp.lt.s32.totalorder %s2201_s14, %s2201_s14 }
  0x28   : > { %p1771_p13 = scmp.ne.s32.totalorder %s2201_s14, %s1770_s13  ;;  %p1779_p4 = scmp.lt.s32.totalorder %s1770_s13, %s1770_s13 }
  0x2a   : > { %p1773_p0 = pnand %p1771_p13, %p2228_p8  ;;  %p1780_p7 = por %p1779_p4, %p1778_p5 }
  0x2c   : > { %p1774_p2 = pneg %p1773_p0 }
  0x2e   : > { %p1781_p9 = pnand %p1780_p7, %p1774_p2 }
  0x30   : > { %1784 = shalt.err (!%p1781_p9)
}
  0x31   : > { %s2102_s17 = smov 64   ;;  %s2103_s20 = smov 4  }
  0x32   : > { %1637 = dma.hbm_to_vmem [thread:$0]  (!%p2212_p6), %s2711_s3, 256, %s2201_s14, [#allocation9], %s2102_s17, %s2102_s17, %s2103_s20  }
  0x33   : > { %s2713_s5 = sld [smem:[#allocation31_spill]] }
  0x39   : > { %s1785_s26 = scalar_lea.hbm %s2713_s5, 256 }
  0x3a   : > { %p1786_p4 = scmp.ne.s32.totalorder %s2713_s5, %s1785_s26  ;;  %p1792_p12 = scmp.lt.u32.totalorder %s1785_s26, %s2713_s5 }
  0x3c   : > { %p1788_p10 = pnand %p1786_p4, %p2228_p8 }
  0x3e   : > { %p1789_p11 = pneg %p1788_p10 }
  0x40   : > { %p1794_p13 = pnand %p1792_p12, %p1789_p11 }
  0x42   : > { %1797 = shalt.err (!%p1794_p13)
}
  0x43   : > { %s1798_s14 = scalar_lea.vmem %s2216_s18, 256  ;;  %p1806_p7 = scmp.lt.s32.totalorder %s2216_s18, %s2216_s18 }
  0x44   : > { %p1799_p0 = scmp.ne.s32.totalorder %s2216_s18, %s1798_s14  ;;  %p1807_p9 = scmp.lt.s32.totalorder %s1798_s14, %s1798_s14 }
  0x46   : > { %p1801_p2 = pnand %p1799_p0, %p2228_p8  ;;  %p1808_p4 = por %p1807_p9, %p1806_p7 }
  0x48   : > { %p1802_p5 = pneg %p1801_p2 }
  0x4a   : > { %p1809_p10 = pnand %p1808_p4, %p1802_p5 }
  0x4c   : > { %1812 = shalt.err (!%p1809_p10)
}
  0x4d   : > { %1643 = dma.hbm_to_vmem [thread:$0]  (!%p2212_p6), %s2713_s5, 256, %s2216_s18, [#allocation12], %s2102_s17, %s2102_s17, %s2103_s20  }
  0x4e   : > { %s2714_s7 = sld [smem:[#allocation32_spill]] }
  0x54   : > { %s1813_s25 = scalar_lea.hbm %s2714_s7, 16 }
  0x55   : > { %p1814_p11 = scmp.ne.s32.totalorder %s2714_s7, %s1813_s25  ;;  %p1820_p0 = scmp.lt.u32.totalorder %s1813_s25, %s2714_s7 }
  0x57   : > { %p1816_p12 = pnand %p1814_p11, %p2228_p8 }
  0x59   : > { %p1817_p13 = pneg %p1816_p12 }
  0x5b   : > { %p1822_p2 = pnand %p1820_p0, %p1817_p13 }
  0x5d   : > { %1825 = shalt.err (!%p1822_p2)
}
  0x5e   : > { %s1826_s18 = scalar_lea.vmem %s2218_s21, 16  ;;  %s1833_s17 = scalar_lea.vmem %s2218_s21, 32 }
  0x5f   : > { %p1827_p5 = scmp.ne.s32.totalorder %s2218_s21, %s1826_s18  ;;  %p1834_p4 = scmp.lt.s32.totalorder %s2218_s21, %s2218_s21 }
  0x60   : > { %p1835_p10 = scmp.lt.s32.totalorder %s1833_s17, %s1826_s18 }
  0x61   : > { %p1829_p7 = pnand %p1827_p5, %p2228_p8 }
  0x62   : > { %p1836_p11 = por %p1835_p10, %p1834_p4 }
  0x63   : > { %p1830_p9 = pneg %p1829_p7 }
  0x65   : > { %p1837_p12 = pnand %p1836_p11, %p1830_p9 }
  0x67   : > { %1840 = shalt.err (!%p1837_p12)
}
  0x68   : > { %1649 = dma.hbm_to_vmem [thread:$0]  (!%p2212_p6), %s2714_s7, 16, %s2218_s21, [#allocation15]  }
  0x69   : > { %s1446_s9 = sadd.s32 4294967294, %s2097_s12   ;;  %s2298_s22 = sadd.s32 1, %s2097_s12  }
  0x6a   : > { %2715 = sst [smem:[#allocation26_spill]] %s2298_s22  ;;  %s38_s23 = sadd.s32 1, %s2093_s11 }
  0x6b   : > { %s35_s24 = ssub.s32 %s2097_s12, %s2298_s22  ;;  %p45_p13 = scmp.ne.s32.totalorder %s2093_s11, %s2089_s10 }
  0x6c   : > { %p36_p0 = scmp.eq.s32.totalorder %s35_s24, 0  ;;  %p46_p2 = scmp.eq.s32.totalorder %s2097_s12, 0 }
  0x6d   : > { %p51_p5 = scmp.ne.s32.totalorder %s2089_s10, %s2085_s30  ;;  %p253_p7 = scmp.eq.s32.totalorder %s2196_s15, 1 }
  0x6e   : > { %s2310_s25 = scalar_select %p36_p0, %s2093_s11, %s38_s23  }
  0x6f   : > { %p47_p9 = por %p46_p2, %p45_p13  ;;  %p2314_p4 = por %p2688_p1, %p51_p5 }
  0x70   : > { %2716 = sst [smem:[#allocation27_spill]] %s2310_s25  ;;  %p2318_p10 = por %p253_p7, %p45_p13 }
  0x71   : > { %s2717_s21 = scalar_select %p2314_p4, 1, 0 }
  0x72   : > { %s2718_s26 = scalar_select %p2318_p10, 1, 0 }
  0x73   : > { %p259_p11 = scmp.eq.s32.totalorder %s1446_s9, 1  ;;  %p1673_p12 = scmp.lt.s32.totalorder %s2097_s12, 2 }
  0x74   : > { %s2685_s28 = sand.u32 1, %s2093_s11   ;;  %s2333_s18 = sshll.u32 %s2097_s12, 7 }
  0x75   : > { %p2324_p3 = por %p259_p11, %p51_p5  ;;  %s2330_s13 = sshll.u32 %s2685_s28, 3 }
  0x76   : > { %p2335_p0 = pnand %p1673_p12, %p47_p9  ;;  %s367_s20 = sand.u32 1, %s2097_s12  }
  0x77   : > { %s2719_s29 = scalar_select %p2324_p3, 1, 0 }
  0x78   : > { %s2721_s17 = scalar_select %p2335_p0, 1, 0 }
  0x79   : > { %2720 = sst [smem:[#allocation28_spill]] %s2719_s29  ;;  %s2722_s1 = sld [smem:[#allocation29_spill]] }
  0x7a   : > { %s371_s24 = scalar_lea.vmem [#allocation5], %s2330_s13  ;;  %s2349_s3 = scalar_lea.sflag [#allocation6], %s367_s20 }
  0x7b   : > { %s378_s28 = sshll.u32 %s371_s24, 4  ;;  %p2355_p2 = pneg %p2335_p0  ;;  %s2347_s28 = int_to_ptr.vmem [resolvable:$true] %s378_s28 }
  0x7d   : > { %s2723_s7 = scalar_select %p2355_p2, 1, 0 }
  0x7f   : > { %s2344_s23 = scalar_lea.hbm %s2722_s1, %s2333_s18  ;;  %s1846_s25 = scalar_lea.hbm %s2722_s1, 256 }
  0x80   : > { %s1841_s5 = scalar_lea.hbm %s2344_s23, 128  ;;  %p1847_p9 = scmp.lt.u32.totalorder %s2344_s23, %s2722_s1 }
  0x81   : > { %p1842_p13 = scmp.ne.s32.totalorder %s2344_s23, %s1841_s5  ;;  %p1848_p11 = scmp.lt.u32.totalorder %s1846_s25, %s1841_s5 }
  0x82   : > { %p1850_p1 = scmp.lt.u32.totalorder %s1841_s5, %s2344_s23 }
  0x83   : > { %p1844_p5 = pnand %p2355_p2, %p1842_p13  ;;  %p1849_p12 = por %p1848_p11, %p1847_p9 }
  0x85   : > { %p1845_p7 = pneg %p1844_p5  ;;  %p1851_p3 = por %p1850_p1, %p1849_p12 }
  0x87   : > { %p1852_p10 = pnand %p1851_p3, %p1845_p7 }
  0x89   : > { %1855 = shalt.err (!%p1852_p10)
}
  0x8a   : > { %s1856_s20 = scalar_lea.vmem %s2347_s28, 128  ;;  %s2104_s14 = smov [#allocation5]  }
  0x8b   : > { %p1857_p13 = scmp.ne.s32.totalorder %s2347_s28, %s1856_s20  ;;  %s1861_s9 = sshll.u32 %s2104_s14, 4  ;;  %s1862_s9 = int_to_ptr.vmem [resolvable:$false] %s1861_s9 }
  0x8c   : > { %s1863_s22 = scalar_lea.vmem %s1862_s9, 256  ;;  %p1864_p6 = scmp.lt.s32.totalorder %s2347_s28, %s1862_s9 }
  0x8d   : > { %p1859_p5 = pnand %p1857_p13, %p2355_p2  ;;  %p1865_p8 = scmp.lt.s32.totalorder %s1863_s22, %s1856_s20 }
  0x8f   : > { %p1860_p4 = pneg %p1859_p5  ;;  %p1866_p9 = por %p1865_p8, %p1864_p6 }
  0x91   : > { %p1867_p11 = pnand %p1866_p9, %p1860_p4 }
  0x93   : > { %1870 = shalt.err (!%p1867_p11)
}
  0x94   : > { %1659 = dma.hbm_to_vmem [thread:$0]  (!%p2335_p0), %s2344_s23, 128, %s2347_s28, %s2349_s3  }
  0x95   : > { %s2105_s5 = smov [#allocation10]   ;;  %s2106_s24 = smov [#allocation13]  }
  0x96   : > { %s292_s25 = sshll.u32 %s2105_s5, 4  ;;  %s316_s1 = sshll.u32 %s2106_s24, 4  ;;  %s293_s25 = int_to_ptr.vmem [resolvable:$true] %s292_s25  ;;  %s317_s1 = int_to_ptr.vmem [resolvable:$true] %s316_s1 }
  0x97   : > { %s1871_s9 = scalar_lea.hbm %s2677_s4, 16  ;;  %p2724_p3 = scmp.ne.s32.totalorder %s2712_s27, 0 }
  0x98   : > { %p1872_p1 = scmp.ne.s32.totalorder %s2677_s4, %s1871_s9  ;;  %p1878_p4 = scmp.lt.u32.totalorder %s1871_s9, %s2677_s4 }
  0x9a   : > { %p1874_p6 = pnand %p1872_p1, %p2724_p3 }
  0x9c   : > { %p1875_p8 = pneg %p1874_p6 }
  0x9e   : > { %p1880_p10 = pnand %p1878_p4, %p1875_p8 }
  0xa0   : > { %1883 = shalt.err (!%p1880_p10)
}
  0xa1   : > { %s1884_s28 = scalar_lea.vmem %s293_s25, 16  ;;  %s1891_s12 = scalar_lea.vmem %s293_s25, 32 }
  0xa2   : > { %p1885_p7 = scmp.ne.s32.totalorder %s293_s25, %s1884_s28  ;;  %p1892_p5 = scmp.lt.s32.totalorder %s293_s25, %s293_s25 }
  0xa3   : > { %p1893_p9 = scmp.lt.s32.totalorder %s1891_s12, %s1884_s28 }
  0xa4   : > { %p1887_p12 = pnand %p1885_p7, %p2724_p3 }
  0xa5   : > { %p1894_p11 = por %p1893_p9, %p1892_p5 }
  0xa6   : > { %p1888_p13 = pneg %p1887_p12 }
  0xa8   : > { %p1895_p0 = pnand %p1894_p11, %p1888_p13 }
  0xaa   : > { %1898 = shalt.err (!%p1895_p0)
}
  0xab   : > { %p2725_p1 = scmp.ne.s32.totalorder %s2710_s19, 0  ;;  %s1899_s24 = scalar_lea.hbm %s2679_s6, 16 }
  0xac   : > { %p1900_p6 = scmp.ne.s32.totalorder %s2679_s6, %s1899_s24  ;;  %p1906_p0 = scmp.lt.u32.totalorder %s1899_s24, %s2679_s6 }
  0xad   : > { %1640 = dma.hbm_to_vmem [thread:$0]  (!%p2725_p1), %s2677_s4, 16, %s293_s25, [#allocation9]  }
  0xae   : > { %p1902_p8 = pnand %p1900_p6, %p2724_p3 }
  0xb0   : > { %p1903_p4 = pneg %p1902_p8 }
  0xb2   : > { %p1908_p10 = pnand %p1906_p0, %p1903_p4 }
  0xb4   : > { %1911 = shalt.err (!%p1908_p10)
}
  0xb5   : > { %s1912_s28 = scalar_lea.vmem %s317_s1, 16  ;;  %s1919_s25 = scalar_lea.vmem %s317_s1, 32 }
  0xb6   : > { %p1913_p7 = scmp.ne.s32.totalorder %s317_s1, %s1912_s28  ;;  %p1920_p5 = scmp.lt.s32.totalorder %s317_s1, %s317_s1 }
  0xb7   : > { %p1921_p9 = scmp.lt.s32.totalorder %s1919_s25, %s1912_s28 }
  0xb8   : > { %p1915_p12 = pnand %p1913_p7, %p2724_p3 }
  0xb9   : > { %p1922_p11 = por %p1921_p9, %p1920_p5 }
  0xba   : > { %p1916_p13 = pneg %p1915_p12 }
  0xbc   : > { %p1923_p2 = pnand %p1922_p11, %p1916_p13 }
  0xbe   : > { %1926 = shalt.err (!%p1923_p2)
}
  0xbf   : > { %1646 = dma.hbm_to_vmem [thread:$0]  (!%p2725_p1), %s2679_s6, 16, %s317_s1, [#allocation12]  }
  0xc0   : > { %s2107_s5 = smov [#allocation16]   ;;  %s1927_s14 = scalar_lea.hbm %s2681_s8, 16 }
  0xc1   : > { %s338_s30 = sshll.u32 %s2107_s5, 4  ;;  %p1928_p6 = scmp.ne.s32.totalorder %s2681_s8, %s1927_s14  ;;  %s339_s30 = int_to_ptr.vmem [resolvable:$true] %s338_s30 }
  0xc2   : > { %p1934_p4 = scmp.lt.u32.totalorder %s1927_s14, %s2681_s8 }
  0xc3   : > { %p1930_p2 = pnand %p1928_p6, %p2724_p3 }
  0xc5   : > { %p1931_p8 = pneg %p1930_p2 }
  0xc7   : > { %p1936_p0 = pnand %p1934_p4, %p1931_p8 }
  0xc9   : > { %1939 = shalt.err (!%p1936_p0)
}
  0xca   : > { %s1940_s1 = scalar_lea.vmem %s339_s30, 16  ;;  %s1947_s25 = scalar_lea.vmem %s339_s30, 32 }
  0xcb   : > { %p1941_p10 = scmp.ne.s32.totalorder %s339_s30, %s1940_s1  ;;  %p1948_p13 = scmp.lt.s32.totalorder %s339_s30, %s339_s30 }
  0xcc   : > { %p1949_p5 = scmp.lt.s32.totalorder %s1947_s25, %s1940_s1 }
  0xcd   : > { %p1943_p7 = pnand %p1941_p10, %p2724_p3 }
  0xce   : > { %p1950_p9 = por %p1949_p5, %p1948_p13 }
  0xcf   : > { %p1944_p12 = pneg %p1943_p7 }
  0xd1   : > { %p1951_p11 = pnand %p1950_p9, %p1944_p12 }
  0xd3   : > { %1954 = shalt.err (!%p1951_p11)
}
  0xd4   : > { %1652 = dma.hbm_to_vmem [thread:$0]  (!%p2725_p1), %s2681_s8, 16, %s339_s30, [#allocation15]  }
  0xd5   : > { %s2437_s29 = scalar_lea.hbm %s2673_s0, %s2333_s18  ;;  %s353_s24 = scalar_lea.vmem [#allocation2], %s2330_s13 }
  0xd6   : > { %s360_s14 = sshll.u32 %s353_s24, 4  ;;  %s2726_s19 = sand.u32 1, %s2093_s11   ;;  %s361_s14 = int_to_ptr.vmem [resolvable:$true] %s360_s14 }
  0xd7   : > { %s350_s9 = scalar_lea.sflag [#allocation3], %s2726_s19  ;;  %s1955_s20 = scalar_lea.hbm %s2437_s29, 128 }
  0xd8   : > { %p1956_p3 = scmp.ne.s32.totalorder %s2437_s29, %s1955_s20  ;;  %p2727_p6 = scmp.ne.s32.totalorder %s2723_s7, 0 }
  0xd9   : > { %s1960_s28 = scalar_lea.hbm %s2673_s0, 256  ;;  %p1961_p1 = scmp.lt.u32.totalorder %s2437_s29, %s2673_s0 }
  0xda   : > { %p1958_p2 = pnand %p1956_p3, %p2727_p6  ;;  %p1962_p4 = scmp.lt.u32.totalorder %s1960_s28, %s1955_s20 }
  0xdb   : > { %p1964_p10 = scmp.lt.u32.totalorder %s1955_s20, %s2437_s29 }
  0xdc   : > { %p1959_p8 = pneg %p1958_p2  ;;  %p1963_p0 = por %p1962_p4, %p1961_p1 }
  0xde   : > { %p1965_p7 = por %p1964_p10, %p1963_p0 }
  0xe0   : > { %p1966_p12 = pnand %p1965_p7, %p1959_p8 }
  0xe2   : > { %1969 = shalt.err (!%p1966_p12)
}
  0xe3   : > { %s1970_s12 = scalar_lea.vmem %s361_s14, 128  ;;  %s2108_s23 = smov [#allocation2]  }
  0xe4   : > { %p1971_p13 = scmp.ne.s32.totalorder %s361_s14, %s1970_s12  ;;  %s1975_s5 = sshll.u32 %s2108_s23, 4  ;;  %s1976_s5 = int_to_ptr.vmem [resolvable:$false] %s1975_s5 }
  0xe5   : > { %s1977_s27 = scalar_lea.vmem %s1976_s5, 256  ;;  %p1978_p11 = scmp.lt.s32.totalorder %s361_s14, %s1976_s5 }
  0xe6   : > { %p1973_p5 = pnand %p1971_p13, %p2727_p6  ;;  %p1979_p3 = scmp.lt.s32.totalorder %s1977_s27, %s1970_s12 }
  0xe8   : > { %p1974_p9 = pneg %p1973_p5  ;;  %p1980_p2 = por %p1979_p3, %p1978_p11 }
  0xea   : > { %p1981_p1 = pnand %p1980_p2, %p1974_p9 }
  0xec   : > { %1984 = shalt.err (!%p1981_p1)
}
  0xed   : > { %p2728_p4 = scmp.ne.s32.totalorder %s2721_s17, 0  ;;  %s2463_s20 = scalar_lea.hbm %s2675_s2, %s2333_s18 }
  0xee   : > { %s389_s30 = scalar_lea.vmem [#allocation7], %s2330_s13  ;;  %s1985_s28 = scalar_lea.hbm %s2463_s20, 128 }
  0xef   : > { %1656 = dma.hbm_to_vmem [thread:$0]  (!%p2728_p4), %s2437_s29, 128, %s361_s14, %s350_s9  }
  0xf0   : > { %s396_s22 = sshll.u32 %s389_s30, 4  ;;  %p1986_p8 = scmp.ne.s32.totalorder %s2463_s20, %s1985_s28  ;;  %s397_s22 = int_to_ptr.vmem [resolvable:$true] %s396_s22 }
  0xf1   : > { %s1990_s29 = scalar_lea.hbm %s2675_s2, 256  ;;  %p1991_p7 = scmp.lt.u32.totalorder %s2463_s20, %s2675_s2 }
  0xf2   : > { %p1988_p0 = pnand %p1986_p8, %p2727_p6  ;;  %p1992_p12 = scmp.lt.u32.totalorder %s1990_s29, %s1985_s28 }
  0xf3   : > { %p1994_p5 = scmp.lt.u32.totalorder %s1985_s28, %s2463_s20 }
  0xf4   : > { %p1989_p10 = pneg %p1988_p0  ;;  %p1993_p13 = por %p1992_p12, %p1991_p7 }
  0xf6   : > { %p1995_p9 = por %p1994_p5, %p1993_p13 }
  0xf8   : > { %p1996_p11 = pnand %p1995_p9, %p1989_p10 }
  0xfa   : > { %1999 = shalt.err (!%p1996_p11)
}
  0xfb   : > { %s2000_s13 = scalar_lea.vmem %s397_s22, 128  ;;  %s2109_s18 = smov [#allocation7]  }
  0xfc   : > { %p2001_p3 = scmp.ne.s32.totalorder %s397_s22, %s2000_s13  ;;  %s2005_s12 = sshll.u32 %s2109_s18, 4  ;;  %s2006_s12 = int_to_ptr.vmem [resolvable:$false] %s2005_s12 }
  0xfd   : > { %s2007_s23 = scalar_lea.vmem %s2006_s12, 256  ;;  %p2008_p8 = scmp.lt.s32.totalorder %s397_s22, %s2006_s12 }
  0xfe   : > { %p2003_p2 = pnand %p2001_p3, %p2727_p6  ;;  %p2009_p0 = scmp.lt.s32.totalorder %s2007_s23, %s2000_s13 }
 0x100   : > { %p2004_p1 = pneg %p2003_p2  ;;  %p2010_p4 = por %p2009_p0, %p2008_p8 }
 0x102   : > { %p2011_p7 = pnand %p2010_p4, %p2004_p1 }
 0x104   : > { %2014 = shalt.err (!%p2011_p7)
}
 0x105   : > { %p2729_p12 = scmp.ne.s32.totalorder %s2721_s17, 0  ;;  %p2730_p10 = scmp.ne.s32.totalorder %s2709_s16, 0 }
 0x106   : > { %s2487_s7 = sand.u32 (!%p2730_p10), 1, %s2089_s10   ;;  %p2731_p6 = scmp.ne.s32.totalorder (!%p2730_p10), %s2717_s21, 0 }
 0x107   : > { %1662 = dma.hbm_to_vmem [thread:$0]  (!%p2729_p12), %s2463_s20, 128, %s397_s22, %s2349_s3  }
 0x108   : > { %405 = sbr.rel (%p2730_p10) target bundleno = 3228 (0xc9c), region = 56  ;;  %s2490_s5 = sshll.u32 (!%p2730_p10), %s2487_s7, 3 }
 0x109   : > { %s408_s27 = scalar_lea.sflag (!%p2730_p10), [#allocation3], %s2487_s7  ;;  %s411_s24 = scalar_lea.vmem (!%p2730_p10), [#allocation2], %s2490_s5 }
 0x10f   : > { %2060 = dma.done.wait (%p2731_p6), %s408_s27, 128  }
 0x110   : > { %2062 = vsyncadd (%p2731_p6), %s408_s27, 4294967168  ;;  %s416_s3 = sand.u32 1, %s2196_s15   ;;  %s420_s17 = scalar_lea.vmem [#allocation5], %s2490_s5 }
 0x111   : > { %s417_s16 = scalar_lea.sflag [#allocation6], %s416_s3 }
 0x112   : > { %2064 = dma.done.wait (%p2731_p6), %s417_s16, 256  }
 0x113   : > { %2066 = vsyncadd (%p2731_p6), %s417_s16, 4294967040  ;;  %s429_s19 = scalar_lea.vmem [#allocation7], %s2490_s5  ;;  %p2732_p4 = scmp.eq.s32.totalorder %s2196_s15, 0 }
 0x115   : > { %2068 = dma.done.wait (%p2732_p4), [#allocation9], 272   ;;  %p2733_p13 = pmov %p2732_p4 }
 0x116   : > { %p2734_p5 = pmov %p2732_p4 }
 0x117   : > { %2070 = vsyncadd (%p2733_p13), [#allocation9], 4294967024 }
 0x118   : > { %2072 = dma.done.wait (%p2734_p5), [#allocation12], 272   ;;  %p2735_p9 = pmov %p2732_p4 }
 0x119   : > { %p2736_p11 = pmov %p2732_p4 }
 0x11a   : > { %2074 = vsyncadd (%p2735_p9), [#allocation12], 4294967024 }
 0x11b   : > { %2076 = dma.done.wait (%p2736_p11), [#allocation15], 32   ;;  %p2737_p3 = pmov %p2732_p4 }
 0x11c   : > { %v2110_v0 = vmov 0.0   ;;  %vm2111_vm0 = vmmov 0   ;;  %v1737_v1 = vld [vmem:[#allocation8] sm:$0xff]   ;;  %v1738_v2 = vld [vmem:[#allocation8 + $0x8] sm:$0xff]   ;;  %v2523_v3 = vld [vmem:[%s411_s24] sm:$0xff]  ;;  %vm524_vm1 = vcmask 261120  }
 0x11d   : > { %2078 = vsyncadd (%p2737_p3), [#allocation15], 4294967264  ;;  %1522 = vmatprep.subr.bf16.mxu0 %v2110_v0  ;;  %1526 = vmatprep.mubr.msk.bf16.mxu0 %vm2111_vm0, %v2110_v0  ;;  %v500_v4 = vpack.c.bf16 %v2523_v3, %v2523_v3  ;;  %v1472_v5 = vld [vmem:[#allocation10] ss:$0 sm:$0xff]  ;;  %s2112_s21 = smov 120   ;;  %s2113_s20 = smov 96  }
 0x11e   : > { %1530 = vmatprep.subr.bf16.mxu1 %v2110_v0  ;;  %1532 = vmatprep.mubr.msk.bf16.mxu1 %vm2111_vm0, %v2110_v0  ;;  %s2114_s30 = smov 88   ;;  %vm577_vm2 = vcmask 64512   ;;  %v2550_v18 = vld [vmem:[%s420_s17] sm:$0xff]  ;;  %s2115_s22 = smov 64   ;;  %vm643_vm3 = vcmask 1043456   ;;  %vm1260_vm4 = vcmask 257024  }
 0x11f   : > { %1523 = vmatpush3.bf16.msra.mxu0 %v1737_v1  ;;  %s2116_s28 = smov 56   ;;  %s2117_s1 = smov 112   ;;  %v568_v54 = vld [vmem:[#allocation11] sm:$0xf]  ;;  %v569_v56 = vld [vmem:[#allocation11 + $0x4] sm:$0xf] }
 0x120   : > { %1524 = vmatprep.subr.bf16.mxu0 %v2110_v0  ;;  %s2118_s25 = smov 80   ;;  %v851_v55 = vsel %vm643_vm3, %v568_v54, 0  ;;  %v805_v57 = vsel %vm643_vm3, %v569_v56, 0  ;;  %s2119_s29 = smov 72  }
 0x121   : > { %s2120_s14 = smov 104   ;;  %s2121_s9 = smov 48  }
 0x122   : > { %s2122_s13 = smov 40   ;;  %s1471_s18 = sshll.u32 %s2487_s7, 2 }
 0x123   : > { %1525 = vmatpush3.bf16.msra.mxu0 %v1738_v2  ;;  %s1492_s12 = sshll.u32 %s2196_s15, 6  ;;  %s497_s23 = scalar_lea.vmem [#allocation17], %s1471_s18 }
 0x124   : > { %1536 = vmatprep.subr.bf16.mxu0 %v2110_v0  ;;  %s1276_s5 = sshll.u32 %s497_s23, 4  ;;  %s2738_s3 = sld [smem:[#allocation33_spill]]  ;;  %s2631_s5 = int_to_ptr.vmem [resolvable:$true] %s1276_s5 }
 0x125   : > { %s1263_s17 = scalar_lea.sflag [#allocation4], %s2487_s7  ;;  %p2739_p1 = scmp.ne.s32.totalorder %s2718_s26, 0 }
 0x126   : > { %1527 = vmatmul.mubr.msk.bf16.vlgmr.msra.gmra.mrb[0].mxu0 %vm524_vm1, %v500_v4  ;;  %s2124_s15 = smov [#allocation17]  }
 0x127   : > { %1538 = vmatprep.mubr.msk.bf16.mxu0 %vm2111_vm0, %v2110_v0 }
 0x12a   : > { %s2629_s16 = scalar_lea.hbm %s2738_s3, %s1492_s12 }
 0x1f9   : > { %v562_v6 = vpop.f32.mrb[0].mxu0 }
 0x1fa   : > { %v563_v7 = vadd.f32 %v1472_v5, %v562_v6  ;;  %v1528_v8 = vpop.f32.mrb[1].mxu0 }
 0x1fb   : > { %v565_v9 = vpop.f32.mrb[2].mxu0 }
 0x1fc   : > { %v2532_v10 = vpack.c.bf16 %v563_v7, %v563_v7  ;;  %v1529_v11 = vpop.f32.mrb[3].mxu0 }
 0x1fe   : > { %688 = vrot.lane.b32.xlu1 %v2532_v10, %s2112_s21  ;;  %575 = vrot.lane.b32.xlu0 %v2532_v10, %s2113_s20  ;;  %s2019_s21 = sshll.u32 %s2124_s15, 4  ;;  %s2020_s21 = int_to_ptr.vmem [resolvable:$false] %s2019_s21 }
 0x1ff   : > { %s2021_s20 = scalar_lea.vmem %s2020_s21, 128  ;;  %p2022_p7 = scmp.lt.s32.totalorder %s2631_s5, %s2020_s21 }
 0x202   : > { %690 = vrot.lane.b32.xlu0 %v2532_v10, %s2114_s30 }
 0x270   : > { %v576_v12 = vpop.permute.xlu0 %575  ;;  %v689_v16 = vpop.permute.xlu1 %688 }
 0x271   : > { %v582_v13 = vsel %vm577_vm2, %v576_v12, 0 }
 0x272   : > { %1531 = vmatpush3.bf16.xpose.msra.mxu1 %v582_v13 }
 0x273   : > { %1542 = vmatprep.subr.bf16.mxu1 %v2110_v0 }
 0x274   : > { %v691_v14 = vpop.permute.xlu0 %690 }
 0x275   : > { %v696_v15 = vsel %vm577_vm2, %v691_v14, 0 }
 0x279   : > { %1533 = vmatmul.mubr.msk.bf16.vlgmr.msra.gmra.mrb[0].mxu1 %vm577_vm2, %v2532_v10 }
 0x27a   : > { %1543 = vmatpush3.bf16.xpose.msra.mxu1 %v696_v15  ;;  %1544 = vmatprep.mubr.msk.bf16.mxu1 %vm2111_vm0, %v2110_v0 }
 0x27b   : > { %1554 = vmatprep.subr.bf16.mxu1 %v2110_v0 }
 0x281   : > { %1545 = vmatmul.mubr.msk.bf16.vlgmr.msra.gmra.mrb[4].mxu1 %vm577_vm2, %v689_v16 }
 0x282   : > { %1556 = vmatprep.mubr.msk.bf16.mxu1 %vm2111_vm0, %v2110_v0  ;;  %1555 = vmatpush3.bf16.msra.mxu1 %v805_v57 }
 0x283   : > { %1566 = vmatprep.subr.bf16.mxu1 %v2110_v0 }
 0x34c   : > { %v618_v17 = vpop.f32.mrb[0].mxu1 }
 0x34d   : > { %v624_v19 = vmul.f32 0.35355338, %v618_v17  ;;  %v1534_v20 = vpop.f32.mrb[1].mxu1 }
 0x34e   : > { %v621_v21 = vpop.f32.mrb[2].mxu1 }
 0x34f   : > { %v1535_v22 = vpop.f32.mrb[3].mxu1  ;;  %v625_v23 = vadd.f32 %v624_v19, %v2550_v18 }
 0x351   : > { %v626_v24 = vsel %vm577_vm2, %v625_v23, -inf }
 0x352   : > { %627 = vmax.xlane.f32.xlu1 %v626_v24 }
 0x354   : > { %v732_v25 = vpop.f32.mrb[4].mxu1 }
 0x355   : > { %v738_v26 = vmul.f32 0.35355338, %v732_v25  ;;  %v1546_v27 = vpop.f32.mrb[5].mxu1 }
 0x356   : > { %v735_v28 = vpop.f32.mrb[6].mxu1 }
 0x357   : > { %v1547_v29 = vpop.f32.mrb[7].mxu1  ;;  %v739_v30 = vadd.f32 %v738_v26, %v2550_v18 }
 0x359   : > { %v740_v31 = vsel %vm577_vm2, %v739_v30, -inf }
 0x35a   : > { %741 = vmax.xlane.f32.xlu0 %v740_v31 }
 0x3df   : > { %v628_v32 = vpop.xlane.xlu1 %627 }
 0x3e0   : > { %v629_v33 = vsub.f32 %v625_v23, %v628_v32 }
 0x3e2   : > { %v630_v34 = vmul.f32 1.442695, %v629_v33 }
 0x3e4   : > { %1739 = vpow2.f32 %v630_v34 }
 0x3e7   : > { %v742_v35 = vpop.xlane.xlu0 %741 }
 0x3e8   : > { %v743_v36 = vsub.f32 %v739_v30, %v742_v35 }
 0x3ea   : > { %v744_v37 = vmul.f32 1.442695, %v743_v36 }
 0x3ec   : > { %1741 = vpow2.f32 %v744_v37 }
 0x3ee   : > { %v1740_v38 = vpop.eup %1739 }
 0x3ef   : > { %v632_v39 = vsel %vm577_vm2, %v1740_v38, 0.0 }
 0x3f0   : > { %633 = vadd.xlane.f32.xlu0 %v632_v39 }
 0x3f6   : > { %v1742_v40 = vpop.eup %1741 }
 0x3f7   : > { %v746_v41 = vsel %vm577_vm2, %v1742_v40, 0.0 }
 0x3f8   : > { %747 = vadd.xlane.f32.xlu1 %v746_v41  ;;  %v570_v41 = vld [vmem:[#allocation11 + $0x8] sm:$0xf] }
 0x406   : > { %638 = vrot.lane.b32.xlu0 %v2532_v10, %s2115_s22 }
 0x409   : > { %752 = vrot.lane.b32.xlu1 %v2532_v10, %s2116_s28 }
 0x40a   : > { %893 = vrot.lane.b32.xlu0 %v2532_v10, %s2117_s1 }
 0x40d   : > { %895 = vrot.lane.b32.xlu1 %v2532_v10, %s2118_s25 }
 0x47d   : > { %v634_v42 = vpop.xlane.xlu0 %633 }
 0x47e   : > { %1743 = vrcp.f32 %v634_v42  ;;  %v1010_v42 = vsel %vm643_vm3, %v570_v41, 0 }
 0x481   : > { %v639_v43 = vpop.permute.xlu0 %638 }
 0x482   : > { %v645_v44 = vsel %vm643_vm3, %v639_v43, 0 }
 0x483   : > { %1537 = vmatpush3.bf16.msra.mxu0 %v645_v44 }
 0x484   : > { %1548 = vmatprep.subr.bf16.mxu0 %v2110_v0 }
 0x485   : > { %v748_v45 = vpop.xlane.xlu1 %747  ;;  %v894_v8 = vpop.permute.xlu0 %893 }
 0x486   : > { %1745 = vrcp.f32 %v748_v45 }
 0x488   : > { %v1744_v46 = vpop.eup %1743 }
 0x489   : > { %v636_v47 = vmul.f32 %v1744_v46, %v1740_v38  ;;  %v753_v48 = vpop.permute.xlu1 %752 }
 0x48a   : > { %v758_v50 = vsel %vm643_vm3, %v753_v48, 0 }
 0x48b   : > { %v637_v49 = vpack.c.bf16 %v636_v47, %v636_v47 }
 0x48d   : > { %1539 = vmatmul.mubr.msk.bf16.vlgmr.msra.gmra.mrb[4].mxu0 %vm577_vm2, %v637_v49  ;;  %v896_v63 = vpop.permute.xlu1 %895 }
 0x48e   : > { %1549 = vmatpush3.bf16.msra.mxu0 %v758_v50  ;;  %1550 = vmatprep.mubr.msk.bf16.mxu0 %vm2111_vm0, %v2110_v0  ;;  %v901_v6 = vsel %vm577_vm2, %v896_v63, 0 }
 0x48f   : > { %1560 = vmatprep.subr.bf16.mxu0 %v2110_v0 }
 0x490   : > { %v1746_v51 = vpop.eup %1745 }
 0x491   : > { %v750_v52 = vmul.f32 %v1746_v51, %v1742_v40 }
 0x493   : > { %v751_v53 = vpack.c.bf16 %v750_v52, %v750_v52 }
 0x495   : > { %1551 = vmatmul.mubr.msk.bf16.vlgmr.msra.gmra.mrb[8].mxu0 %vm577_vm2, %v751_v53 }
 0x496   : > { %1562 = vmatprep.mubr.msk.bf16.mxu0 %vm2111_vm0, %v2110_v0  ;;  %1561 = vmatpush3.bf16.msra.mxu0 %v851_v55 }
 0x497   : > { %1572 = vmatprep.subr.bf16.mxu0 %v2110_v0 }
 0x560   : > { %v681_v58 = vpop.f32.mrb[4].mxu0 }
 0x561   : > { %v687_v59 = vpack.c.bf16 %v681_v58, %v681_v58  ;;  %v1540_v60 = vpop.f32.mrb[5].mxu0 }
 0x562   : > { %v684_v61 = vpop.f32.mrb[6].mxu0 }
 0x563   : > { %v1541_v62 = vpop.f32.mrb[7].mxu0  ;;  %1563 = vmatmul.mubr.msk.bf16.vlgmr.msra.gmra.mrb[12].mxu0 %vm577_vm2, %v687_v59 }
 0x564   : > { %1574 = vmatprep.mubr.msk.bf16.mxu0 %vm2111_vm0, %v2110_v0 }
 0x568   : > { %v794_v1 = vpop.f32.mrb[8].mxu0 }
 0x569   : > { %v800_v2 = vpack.c.bf16 %v794_v1, %v794_v1  ;;  %v1552_v4 = vpop.f32.mrb[9].mxu0 }
 0x56a   : > { %v797_v5 = vpop.f32.mrb[10].mxu0 }
 0x56b   : > { %v1553_v7 = vpop.f32.mrb[11].mxu0  ;;  %1557 = vmatmul.mubr.msk.bf16.vlgmr.msra.gmra.mrb[8].mxu1 %vm577_vm2, %v800_v2 }
 0x56c   : > { %1567 = vmatpush3.bf16.xpose.msra.mxu1 %v901_v6  ;;  %1568 = vmatprep.mubr.msk.bf16.mxu1 %vm2111_vm0, %v2110_v0 }
 0x56d   : > { %1578 = vmatprep.subr.bf16.mxu1 %v2110_v0 }
 0x573   : > { %1569 = vmatmul.mubr.msk.bf16.vlgmr.msra.gmra.mrb[12].mxu1 %vm577_vm2, %v894_v8  ;;  %v1221_v8 = vld [vmem:[%s429_s19] sm:$0xff]  ;;  %s2015_s19 = scalar_lea.vmem %s2631_s5, 64 }
 0x574   : > { %1580 = vmatprep.mubr.msk.bf16.mxu1 %vm2111_vm0, %v2110_v0  ;;  %1579 = vmatpush3.bf16.msra.mxu1 %v1010_v42  ;;  %p2016_p2 = scmp.ne.s32.totalorder %s2631_s5, %s2015_s19  ;;  %p2023_p12 = scmp.lt.s32.totalorder %s2021_s20, %s2015_s19 }
 0x575   : > { %1590 = vmatprep.subr.bf16.mxu1 %v2110_v0 }
 0x576   : > { %p2017_p8 = pnand %p2016_p2, %p2739_p1  ;;  %p2024_p10 = por %p2023_p12, %p2022_p7 }
 0x578   : > { %p2018_p0 = pneg %p2017_p8 }
 0x57a   : > { %p2025_p6 = pnand %p2024_p10, %p2018_p0 }
 0x636   : > { %v887_v9 = vpop.f32.mrb[12].mxu0 }
 0x637   : > { %v1564_v11 = vpop.f32.mrb[13].mxu0 }
 0x638   : > { %v890_v12 = vpop.f32.mrb[14].mxu0 }
 0x639   : > { %v1565_v13 = vpop.f32.mrb[15].mxu0 }
 0x63e   : > { %v841_v14 = vpop.f32.mrb[8].mxu1 }
 0x63f   : > { %v2587_v15 = vadd.f32 %v887_v9, %v841_v14  ;;  %v1558_v16 = vpop.f32.mrb[9].mxu1  ;;  %v2123_v9 = vmov 0  }
 0x640   : > { %v844_v17 = vpop.f32.mrb[10].mxu1  ;;  %1735 = vset.pattern.permute.xlu1 %v2123_v9  ;;  %1736 = vset.pattern.permute.xlu0 %v2123_v9 }
 0x641   : > { %v1559_v19 = vpop.f32.mrb[11].mxu1 }
 0x642   : > { %v1488_v19 = vld [vmem:[#allocation13] ss:$0 sm:$0xff] }
 0x646   : > { %v937_v20 = vpop.f32.mrb[12].mxu1 }
 0x647   : > { %v943_v21 = vmul.f32 0.35355338, %v937_v20  ;;  %v1570_v22 = vpop.f32.mrb[13].mxu1 }
 0x648   : > { %v940_v23 = vpop.f32.mrb[14].mxu1 }
 0x649   : > { %v1571_v24 = vpop.f32.mrb[15].mxu1  ;;  %v944_v25 = vadd.f32 %v943_v21, %v2550_v18 }
 0x64b   : > { %v945_v26 = vsel %vm577_vm2, %v944_v25, -inf }
 0x64c   : > { %946 = vmax.xlane.f32.xlu1 %v945_v26 }
 0x65d   : > { %1055 = vrot.lane.b32.xlu1 %v2532_v10, %s2119_s29 }
 0x661   : > { %1053 = vrot.lane.b32.xlu1 %v2532_v10, %s2120_s14 }
 0x6d9   : > { %v947_v27 = vpop.xlane.xlu1 %946 }
 0x6da   : > { %v948_v28 = vsub.f32 %v944_v25, %v947_v27 }
 0x6dc   : > { %v949_v29 = vmul.f32 1.442695, %v948_v28 }
 0x6dd   : > { %v1056_v37 = vpop.permute.xlu1 %1055 }
 0x6de   : > { %1747 = vpow2.f32 %v949_v29  ;;  %v1061_v39 = vsel %vm577_vm2, %v1056_v37, 0 }
 0x6e1   : > { %v1054_v40 = vpop.permute.xlu1 %1053 }
 0x6e8   : > { %v1748_v30 = vpop.eup %1747 }
 0x6e9   : > { %v951_v31 = vsel %vm577_vm2, %v1748_v30, 0.0 }
 0x6ea   : > { %952 = vadd.xlane.f32.xlu0 %v951_v31 }
 0x700   : > { %957 = vrot.lane.b32.xlu0 %v2532_v10, %s2121_s9 }
 0x777   : > { %v953_v32 = vpop.xlane.xlu0 %952 }
 0x778   : > { %1749 = vrcp.f32 %v953_v32 }
 0x77b   : > { %v958_v33 = vpop.permute.xlu0 %957 }
 0x77c   : > { %v963_v34 = vsel %vm643_vm3, %v958_v33, 0 }
 0x77d   : > { %1573 = vmatpush3.bf16.msra.mxu0 %v963_v34 }
 0x77e   : > { %1584 = vmatprep.subr.bf16.mxu0 %v2110_v0 }
 0x782   : > { %v1750_v35 = vpop.eup %1749 }
 0x783   : > { %v955_v36 = vmul.f32 %v1750_v35, %v1748_v30 }
 0x785   : > { %v956_v38 = vpack.c.bf16 %v955_v36, %v955_v36  ;;  %v1489_v36 = vld [vmem:[#allocation14] ss:$0 sm:$0xff] }
 0x787   : > { %1575 = vmatmul.mubr.msk.bf16.vlgmr.msra.gmra.mrb[16].mxu0 %vm577_vm2, %v956_v38  ;;  %v1490_v38 = vld [vmem:[#allocation16] ss:$0 sm:$0xff] }
 0x788   : > { %1585 = vmatpush3.bf16.xpose.msra.mxu0 %v1061_v39  ;;  %1586 = vmatprep.mubr.msk.bf16.mxu0 %vm2111_vm0, %v2110_v0 }
 0x789   : > { %1596 = vmatprep.subr.bf16.mxu0 %v2110_v0 }
 0x78f   : > { %1587 = vmatmul.mubr.msk.bf16.vlgmr.msra.gmra.mrb[20].mxu0 %vm577_vm2, %v1054_v40 }
 0x790   : > { %1598 = vmatprep.mubr.msk.bf16.mxu0 %vm2111_vm0, %v2110_v0 }
 0x85a   : > { %v999_v43 = vpop.f32.mrb[16].mxu0 }
 0x85b   : > { %v1005_v44 = vpack.c.bf16 %v999_v43, %v999_v43  ;;  %v1576_v45 = vpop.f32.mrb[17].mxu0 }
 0x85c   : > { %v1002_v46 = vpop.f32.mrb[18].mxu0 }
 0x85d   : > { %v1577_v47 = vpop.f32.mrb[19].mxu0  ;;  %1581 = vmatmul.mubr.msk.bf16.vlgmr.msra.gmra.mrb[16].mxu1 %vm577_vm2, %v1005_v44 }
 0x85e   : > { %1592 = vmatprep.mubr.msk.bf16.mxu1 %vm2111_vm0, %v2110_v0 }
 0x862   : > { %v1097_v48 = vpop.f32.mrb[20].mxu0 }
 0x863   : > { %v1103_v49 = vmul.f32 0.35355338, %v1097_v48  ;;  %v1588_v50 = vpop.f32.mrb[21].mxu0 }
 0x864   : > { %v1100_v51 = vpop.f32.mrb[22].mxu0 }
 0x865   : > { %v1589_v52 = vpop.f32.mrb[23].mxu0  ;;  %v1104_v53 = vadd.f32 %v1103_v49, %v2550_v18  ;;  %v571_v18 = vld [vmem:[#allocation11 + $0xc] sm:$0xf] }
 0x866   : > { %v1170_v61 = vsel %vm643_vm3, %v571_v18, 0 }
 0x867   : > { %v1105_v54 = vsel %vm577_vm2, %v1104_v53, -inf  ;;  %1597 = vmatpush3.bf16.msra.mxu0 %v1170_v61 }
 0x868   : > { %1106 = vmax.xlane.f32.xlu0 %v1105_v54 }
 0x87e   : > { %1117 = vrot.lane.b32.xlu0 %v2532_v10, %s2122_s13 }
 0x8f5   : > { %v1107_v55 = vpop.xlane.xlu0 %1106 }
 0x8f6   : > { %v1108_v56 = vsub.f32 %v1104_v53, %v1107_v55 }
 0x8f8   : > { %v1109_v57 = vmul.f32 1.442695, %v1108_v56 }
 0x8f9   : > { %v1118_v58 = vpop.permute.xlu0 %1117 }
 0x8fa   : > { %1751 = vpow2.f32 %v1109_v57  ;;  %v1123_v0 = vsel %vm643_vm3, %v1118_v58, 0 }
 0x8fb   : > { %1591 = vmatpush3.bf16.msra.mxu1 %v1123_v0 }
 0x904   : > { %v1752_v59 = vpop.eup %1751 }
 0x905   : > { %v1111_v60 = vsel %vm577_vm2, %v1752_v59, 0.0 }
 0x906   : > { %1112 = vadd.xlane.f32.xlu1 %v1111_v60 }
 0x917   : > { %1224 = vperm.xlu1 %1735, %v1221_v8  }
 0x930   : > { %v1046_v62 = vpop.f32.mrb[16].mxu1 }
 0x931   : > { %v1052_v10 = vadd.f32 %v1046_v62, %v2587_v15  ;;  %v1582_v63 = vpop.f32.mrb[17].mxu1 }
 0x932   : > { %v1049_v1 = vpop.f32.mrb[18].mxu1 }
 0x933   : > { %v1583_v2 = vpop.f32.mrb[19].mxu1 }
 0x993   : > { %v1113_v4 = vpop.xlane.xlu1 %1112 }
 0x994   : > { %1753 = vrcp.f32 %v1113_v4 }
 0x997   : > { %v1225_v16 = vpop.permute.xlu1 %1224 }
 0x998   : > { %v1227_v22 = vmul.f32 %v1225_v16, %v2523_v3 }
 0x99e   : > { %v1754_v5 = vpop.eup %1753 }
 0x99f   : > { %v1115_v6 = vmul.f32 %v1754_v5, %v1752_v59 }
 0x9a1   : > { %v1116_v7 = vpack.c.bf16 %v1115_v6, %v1115_v6 }
 0x9a3   : > { %1593 = vmatmul.mubr.msk.bf16.vlgmr.msra.gmra.mrb[20].mxu1 %vm577_vm2, %v1116_v7 }
 0xa76   : > { %v1159_v11 = vpop.f32.mrb[20].mxu1 }
 0xa77   : > { %v1165_v12 = vpack.c.bf16 %v1159_v11, %v1159_v11  ;;  %v1594_v13 = vpop.f32.mrb[21].mxu1 }
 0xa78   : > { %v1162_v14 = vpop.f32.mrb[22].mxu1 }
 0xa79   : > { %v1595_v15 = vpop.f32.mrb[23].mxu1  ;;  %1599 = vmatmul.mubr.msk.bf16.vlgmr.msra.gmra.mrb[24].mxu0 %vm577_vm2, %v1165_v12 }
 0xb4c   : > { %v1206_v17 = vpop.f32.mrb[24].mxu0 }
 0xb4d   : > { %v1212_v20 = vadd.f32 %v1206_v17, %v1052_v10  ;;  %v1600_v21 = vpop.f32.mrb[25].mxu0 }
 0xb4e   : > { %v1209_v23 = vpop.f32.mrb[26].mxu0 }
 0xb4f   : > { %v1220_v24 = vadd.f32 %v1488_v19, %v1212_v20  ;;  %v1601_v25 = vpop.f32.mrb[27].mxu0 }
 0xb51   : > { %v1230_v26 = vadd.f32 %v1227_v22, %v1220_v24 }
 0xb53   : > { %v1231_v27 = vsel %vm524_vm1, %v1230_v26, 0.0 }
 0xb54   : > { %1232 = vadd.xlane.f32.xlu0 %v1231_v27 }
 0xbe1   : > { %v1233_v28 = vpop.xlane.xlu0 %1232 }
 0xbe2   : > { %v1235_v29 = vmul.f32 0.03125, %v1233_v28 }
 0xbe4   : > { %v1236_v30 = vsub.f32 %v1230_v26, %v1235_v29 }
 0xbe6   : > { %v1237_v31 = vmul.f32 %v1236_v30, %v1236_v30 }
 0xbe8   : > { %v1238_v32 = vsel %vm524_vm1, %v1237_v31, 0.0 }
 0xbe9   : > { %1239 = vadd.xlane.f32.xlu1 %v1238_v32 }
 0xc76   : > { %v1240_v33 = vpop.xlane.xlu1 %1239 }
 0xc77   : > { %v1241_v34 = vmul.f32 0.03125, %v1240_v33 }
 0xc79   : > { %v1242_v35 = vadd.f32 1e-05, %v1241_v34 }
 0xc7b   : > { %1755 = vrsqrt.f32 %v1242_v35 }
 0xc85   : > { %v1756_v3 = vpop.eup %1755 }
 0xc86   : > { %v1244_v37 = vmul.f32 %v1756_v3, %v1236_v30 }
 0xc88   : > { %v1251_v39 = vmul.f32 %v1489_v36, %v1244_v37 }
 0xc8a   : > { %v1258_v40 = vadd.f32 %v1490_v38, %v1251_v39 }
 0xc8c   : > { %v1259_v41 = vpack.c.bf16 %v1258_v40, %v1258_v40 }
 0xc8e   : > { %1261 = vst.msk [vmem:[%s497_s23] sm:$0xf] %vm1260_vm4, %v1259_v41 }
 0xc8f   : > { %2028 = shalt.err (!%p2025_p6)
}
 0xc90   : > { %s2029_s7 = scalar_lea.hbm %s2629_s16, 64  ;;  %s2033_s28 = scalar_lea.hbm %s2738_s3, 128 }
 0xc91   : > { %p2030_p4 = scmp.ne.s32.totalorder %s2629_s16, %s2029_s7  ;;  %p2034_p9 = scmp.lt.u32.totalorder %s2629_s16, %s2738_s3 }
 0xc92   : > { %p2035_p11 = scmp.lt.u32.totalorder %s2033_s28, %s2029_s7  ;;  %p2037_p2 = scmp.lt.u32.totalorder %s2029_s7, %s2629_s16 }
 0xc93   : > { %p2031_p13 = pnand %p2030_p4, %p2739_p1 }
 0xc94   : > { %p2036_p3 = por %p2035_p11, %p2034_p9 }
 0xc95   : > { %p2032_p5 = pneg %p2031_p13 }
 0xc96   : > { %p2038_p8 = por %p2037_p2, %p2036_p3 }
 0xc98   : > { %p2039_p0 = pnand %p2038_p8, %p2032_p5 }
 0xc9a   : > { %2042 = shalt.err (!%p2039_p0)
}
 0xc9b   : > { %1632 = dma.vmem_to_hbm [thread:$0]  (%p2739_p1), %s2631_s5, 64, %s2629_s16, %s1263_s17  }
 0xc9c PF: > { %s2740_s29 = sld [smem:[#allocation24_spill]]  ;;  %s2741_s14 = sld [smem:[#allocation28_spill]] }
 0xc9d   : > { %s2742_s9 = sld [smem:[#allocation25_spill]] }
 0xca2   : > { %s1288_s13 = sand.u32 1, %s2740_s29   ;;  %p2743_p7 = scmp.ne.s32.totalorder %s2741_s14, 0 }
 0xca3   : > { %p2744_p12 = scmp.ge.s32.totalorder %s2742_s9, 2  ;;  %s1289_s18 = scalar_lea.sflag [#allocation4], %s1288_s13 }
 0xca5   : > { %p1664_p10 = pnand %p2744_p12, %p2743_p7 }
 0xca7   : > { %2080 = dma.done.wait (!%p1664_p10), %s1289_s18, 64  }
 0xca8   : > { %2082 = vsyncadd (!%p1664_p10), %s1289_s18, 4294967232  ;;  %s2745_s12 = sld [smem:[#allocation26_spill]]  ;;  %s2746_s23 = sld [smem:[#allocation27_spill]] }
 0xca9   : > { %s2747_s30 = smov %s2089_s10  ;;  %s2748_s10 = smov %s2093_s11 }
 0xcae   : > { %p28_p6 = scmp.ge.s32.totalorder %s2745_s12, 4   ;;  %s2749_s11 = smov %s2746_s23 }
 0xcb0   :  { %30 = sbr.rel (!%p28_p6) target bundleno = 16 (0x10), region = 149 }
 0xcb7   :  { %1294 = vsyncpa [#allocation3], 1 }
 0xcb8   :  { %1296 = vsyncpa [#allocation3 + $0x1], 1 }
 0xcb9   :  { %1297 = vsyncpa [#allocation6], 1 }
 0xcba   :  { %1299 = vsyncpa [#allocation6 + $0x1], 1 }
 0xcbb   :  { %1300 = vsyncpa [#allocation9], 1 }
 0xcbc   :  { %1301 = vsyncpa [#allocation12], 1 }
 0xcbd   :  { %1302 = vsyncpa [#allocation15], 1 }
 0xcbe   :  { %1303 = vsyncpa [#allocation4], 1 }
 0xcbf   :  { %1305 = vsyncpa [#allocation4 + $0x1], 1 }

</bundles_post_ra>
